<compile_context>
chip_gen: v7x
topology: tpu7x:2x2x1
jax: 0.10.0
libtpu: 0.0.40
codegen_flags: <defaults>
</compile_context>

<pallas_src>
import functools

import jax
import jax.numpy as jnp
from jax import lax
from jax.experimental import pallas as pl
from jax.experimental.pallas import tpu as pltpu


def _bottleneck_kernel(x_ref, w1_ref, b1_ref, w2_ref, b2_ref, w3_ref, b3_ref,
                       out_ref, pad_ref, *, per_tap):
    NB, H, W, cin = x_ref.shape
    width = w1_ref.shape[1]          # padded bottleneck width
    cout = w3_ref.shape[1]           # padded output channels (== cin)
    M = NB * H * W
    cdt = w1_ref.dtype               # MXU input dtype (f32 or bf16); acc in f32

    # ---- conv1 (1x1, bn1 folded into w1) + bias + relu ------------------------
    y = jnp.dot(x_ref[...].reshape(M, cin).astype(cdt), w1_ref[...],
                preferred_element_type=jnp.float32)
    y = jnp.maximum(y + b1_ref[...], 0.0)

    # ---- conv2 (3x3, pad=1, stride=1, bn2 folded into w2) ---------------------
    # H-halo scratch (halo offset only on the OUTER H axis -> aligned stores);
    # only the two halo rows are zeroed, the interior is fully overwritten
    # every grid step (keeps megacore-parallel sharding correct).
    zrow = jnp.zeros((NB, 1, W, width), pad_ref.dtype)
    pad_ref[:, 0:1, :, :] = zrow
    pad_ref[:, H + 1:H + 2, :, :] = zrow
    pad_ref[:, 1:H + 1, :, :] = y.reshape(NB, H, W, width).astype(pad_ref.dtype)

    # W-boundary masks for the kw=-1 / kw=+1 taps, hoisted out of the kh loop.
    w_idx = lax.broadcasted_iota(jnp.int32, (NB, H, W, width), 2)
    m_km1 = w_idx >= 1           # out[w] = rows[w-1] valid for w >= 1
    m_kp1 = w_idx < (W - 1)      # out[w] = rows[w+1] valid for w <  W-1

    acc = jnp.zeros((M, width), jnp.float32)
    for kh in range(3):                          # static unroll
        # cheap outer-H address offset read; rolls are done in f32 (packed-bf16
        # sublane rotates are not relied on), cast to the MXU dtype once below.
        rows = pad_ref[:, kh:kh + H, :, :].astype(jnp.float32)
        km1 = jnp.where(m_km1, pltpu.roll(rows, shift=1, axis=2), 0.0)
        kp1 = jnp.where(m_kp1, pltpu.roll(rows, shift=W - 1, axis=2), 0.0)
        if per_tap:
            # v5e path: K = width already fills the 128-deep MXU; skip the slab
            # materialization (single vst slot is the scarce resource there).
            for t, tap in enumerate((km1, rows, kp1)):
                r0 = (kh * 3 + t) * width
                acc = acc + jnp.dot(
                    tap.reshape(M, width).astype(cdt),
                    w2_ref[r0:r0 + width, :],
                    preferred_element_type=jnp.float32)
        else:
            # v6e/v7x path: concat kw taps along channels -> K = 3*width fills
            # the 256-deep MXU.
            slab = jnp.concatenate([km1, rows, kp1], axis=-1)
            acc = acc + jnp.dot(
                slab.reshape(M, 3 * width).astype(cdt),
                w2_ref[kh * 3 * width:(kh + 1) * 3 * width, :],
                preferred_element_type=jnp.float32)

    y = jnp.maximum(acc + b2_ref[...], 0.0)      # bn2 bias + relu

    # ---- conv3 (1x1, bn3 folded into w3) + bias -------------------------------
    y = jnp.dot(y.astype(cdt), w3_ref[...], preferred_element_type=jnp.float32)
    y = y + b3_ref[...]

    # ---- identity residual (downsample=None) + relu ---------------------------
    # Re-read the input tile (it is resident in the VMEM input buffer) instead
    # of keeping a loaded copy live across all matmuls.
    y = y + x_ref[...].reshape(M, cin).astype(jnp.float32)
    y = jnp.maximum(y, 0.0)
    out_ref[...] = y.reshape(NB, H, W, cout).astype(out_ref.dtype)


def bottleneck_pallas(x_nhwc, params, *, compute_dtype=jnp.float32,
                      io_dtype=None, per_tap_matmuls=False,
                      lane_multiple=128, batch_block=1):
    """Fused Bottleneck forward on TPU.

    x_nhwc: (N, H, W, Cin).  params: kernel-layout weights (see init_params).
    compute_dtype=jnp.bfloat16: bf16 MXU inputs with f32 accumulation
      (intermediate activations are rounded to bf16 between layers; the bn
      folding removes half of those rounding steps).
    io_dtype: dtype of the activation I/O through HBM (default: x dtype);
      bf16 I/O is the fast path for HBM-bound bf16 configurations.
    per_tap_matmuls=True: 9 accumulated K=width matmuls instead of the
      K=3*width concat slab (recommended on v5e).
    batch_block: images per grid step; default 1 so the grid has N steps
      (pipelined activation DMA + megacore sharding on v7x).
    """
    N, H, W, Cin = x_nhwc.shape
    width = params["w1"].shape[1]
    Cout = params["w3"].shape[1]
    assert Cin == Cout, "identity residual requires inplanes == planes*expansion"

    rup = lambda v: -(-v // lane_multiple) * lane_multiple
    Cin_p, width_p, Cout_p = rup(Cin), rup(width), rup(Cout)
    assert Cin_p == Cout_p

    cdt = jnp.dtype(compute_dtype)
    io_dt = jnp.dtype(x_nhwc.dtype if io_dtype is None else io_dtype)

    # ---- fold the "bn" 1x1 matrices into the adjacent convs (in f32) ----------
    w1f = params["w1"] @ params["g1"]                               # (Cin, width)
    w2f = jnp.einsum("tio,oc->tic", params["w2"], params["g2"])     # (9, w, w)
    w3f = params["w3"] @ params["g3"]                               # (width, Cout)

    pad2 = lambda a, r, c: jnp.pad(a, ((0, r - a.shape[0]), (0, c - a.shape[1])))
    # Lane-dense (zero-padded to a multiple of 128) weights, cast to the MXU
    # dtype in HBM; biases stay f32 (added to the f32 accumulator).
    w1 = pad2(w1f, Cin_p, width_p).astype(cdt)
    w2 = jnp.pad(w2f, ((0, 0), (0, width_p - width), (0, width_p - width)))
    w2 = w2.reshape(9 * width_p, width_p).astype(cdt)   # tap-major (kh,kw) rows
    w3 = pad2(w3f, width_p, Cout_p).astype(cdt)
    b1 = pad2(params["b1"], 1, width_p)
    b2 = pad2(params["b2"], 1, width_p)
    b3 = pad2(params["b3"], 1, Cout_p)

    xp = jnp.pad(x_nhwc, ((0, 0), (0, 0), (0, 0), (0, Cin_p - Cin))).astype(io_dt)

    NB = batch_block
    assert N % NB == 0, "batch_block must divide N"
    grid = (N // NB,)

    def weight_spec(arr):
        nd = arr.ndim
        # Constant across the grid -> single-buffered (saves VMEM, no DMA loss).
        return pl.BlockSpec(arr.shape, lambda n, _nd=nd: (0,) * _nd,
                            pipeline_mode=pl.Buffered(1))

    weights = (w1, b1, w2, b2, w3, b3)

    # ---- VMEM budget (derived from actual sizes) & cost estimate --------------
    isz = lambda dt: jnp.dtype(dt).itemsize
    nbytes = lambda a: int(a.size) * a.dtype.itemsize
    M_step = NB * H * W
    in_blk = NB * H * W * Cin_p * isz(io_dt)
    out_blk = NB * H * W * Cout_p * isz(io_dt)
    w_bytes = sum(nbytes(a) for a in weights)
    scratch_bytes = NB * (H + 2) * W * width_p * isz(cdt)
    interm_bytes = (M_step * 3 * width_p * 4        # f32 slab / rolled taps
                    + 2 * M_step * width_p * 4      # acc + y
                    + M_step * Cout_p * 4)          # pre-store f32 result
    vmem_est = 2 * (in_blk + out_blk) + w_bytes + scratch_bytes + interm_bytes
    vmem_limit = int(min(100 * 2**20, max(32 * 2**20, 2 * vmem_est)))

    Mtot = N * H * W
    flops = 2 * Mtot * (Cin_p * width_p            # conv1+bn1 (folded)
                        + 9 * width_p * width_p    # conv2+bn2 (folded)
                        + width_p * Cout_p)        # conv3+bn3 (folded)
    bytes_accessed = nbytes(xp) + w_bytes + Mtot * Cout_p * isz(io_dt)

    kernel = functools.partial(_bottleneck_kernel, per_tap=per_tap_matmuls)

    out_p = pl.pallas_call(
        kernel,
        out_shape=jax.ShapeDtypeStruct((N, H, W, Cout_p), io_dt),
        grid_spec=pltpu.PrefetchScalarGridSpec(
            num_scalar_prefetch=0,
            grid=grid,
            in_specs=[
                pl.BlockSpec((NB, H, W, Cin_p), lambda n: (n, 0, 0, 0)),
                *[weight_spec(a) for a in weights],
            ],
            out_specs=pl.BlockSpec((NB, H, W, Cout_p), lambda n: (n, 0, 0, 0)),
            # H-halo conv2 scratch (halo only on the outer H axis), in the
            # compute dtype so bf16 mode halves the largest VMEM consumer.
            scratch_shapes=[pltpu.VMEM((NB, H + 2, W, width_p), cdt)],
        ),
        compiler_params=pltpu.CompilerParams(
            dimension_semantics=("parallel",),
            vmem_limit_bytes=vmem_limit),
        cost_estimate=pl.CostEstimate(
            flops=int(flops), transcendentals=0,
            bytes_accessed=int(bytes_accessed)),
    )(xp, w1, b1, w2, b2, w3, b3)

    return out_p[..., :Cout]        # drop lane padding


def _reference(x_nhwc, params):
    """Pure-JAX NHWC reference of the Bottleneck forward (f32, unfused)."""
    y = jnp.einsum("nhwc,co->nhwo", x_nhwc, params["w1"])
    y = jnp.einsum("nhwc,co->nhwo", y, params["g1"]) + params["b1"]
    y = jax.nn.relu(y)
    w2_hwio = params["w2"].reshape(3, 3, *params["w2"].shape[1:])
    y = lax.conv_general_dilated(
        y, w2_hwio, window_strides=(1, 1), padding=((1, 1), (1, 1)),
        dimension_numbers=("NHWC", "HWIO", "NHWC"))
    y = jnp.einsum("nhwc,co->nhwo", y, params["g2"]) + params["b2"]
    y = jax.nn.relu(y)
    y = jnp.einsum("nhwc,co->nhwo", y, params["w3"])
    y = jnp.einsum("nhwc,co->nhwo", y, params["g3"]) + params["b3"]
    return jax.nn.relu(y + x_nhwc)


def init_params(key, inplanes, planes, base_width=64, groups=1):
    """Deterministic synthetic weights (kernel layout: (Cin, Cout) matmul form)."""
    expansion = 4
    width = int(planes * (base_width / 64.0)) * groups
    cout = planes * expansion
    ks = jax.random.split(key, 8)
    s = 0.1
    return {
        # conv1: torch (width, inplanes, 1, 1) -> (inplanes, width)
        "w1": s * jax.random.normal(ks[0], (inplanes, width), jnp.float32),
        # bn1 (1x1 conv with bias): (width, width, 1, 1) -> (width, width), bias (1, width)
        "g1": s * jax.random.normal(ks[1], (width, width), jnp.float32),
        "b1": s * jax.random.normal(ks[2], (1, width), jnp.float32),
        # conv2: torch (width, width, 3, 3) -> (9, width_in, width_out) [tap-major HWIO]
        "w2": s * jax.random.normal(ks[3], (9, width, width), jnp.float32),
        "g2": s * jax.random.normal(ks[4], (width, width), jnp.float32),
        "b2": s * jax.random.normal(ks[5], (1, width), jnp.float32),
        # conv3: torch (4*planes, width, 1, 1) -> (width, 4*planes)
        "w3": s * jax.random.normal(ks[6], (width, cout), jnp.float32),
        "g3": s * jax.random.normal(ks[7], (cout, cout), jnp.float32),
        "b3": s * jnp.sin(jnp.arange(cout, dtype=jnp.float32))[None, :],
    }


if __name__ == "__main__":
    key = jax.random.PRNGKey(0)
    k_x, k_p = jax.random.split(key)

    # Bottleneck(inplanes=32, planes=8): width=8, out channels=32 (== inplanes,
    # so the identity residual path is valid with downsample=None, stride=1).
    N, H, W = 2, 8, 8
    inplanes, planes = 32, 8

    x_nchw = jax.random.normal(k_x, (N, inplanes, H, W), jnp.float32)
    x_nhwc = jnp.transpose(x_nchw, (0, 2, 3, 1))  # layout: NCHW -> NHWC

    params = init_params(k_p, inplanes, planes)
    ref = _reference(x_nhwc, params)

    # f32 MXU path (exact-ish vs reference; also validates the bn folding).
    out = jax.block_until_ready(bottleneck_pallas(x_nhwc, params))
    assert out.shape == (N, H, W, planes * 4)
    assert jnp.allclose(out, ref, atol=1e-4, rtol=1e-4), "f32 mismatch vs reference"

    # per-tap conv2 path (v5e-style), f32.
    out_tap = jax.block_until_ready(
        bottleneck_pallas(x_nhwc, params, per_tap_matmuls=True))
    assert jnp.allclose(out_tap, ref, atol=1e-4, rtol=1e-4), "per-tap mismatch"

    # bf16 MXU-input path, f32 accumulation, f32 I/O — loose tolerance.
    out_bf = jax.block_until_ready(
        bottleneck_pallas(x_nhwc, params, compute_dtype=jnp.bfloat16))
    assert jnp.allclose(out_bf, ref, atol=5e-2, rtol=5e-2), "bf16 path mismatch"

    # bf16 compute + bf16 activation I/O (HBM-bound fast path) — looser still.
    out_bf_io = jax.block_until_ready(
        bottleneck_pallas(x_nhwc, params, compute_dtype=jnp.bfloat16,
                          io_dtype=jnp.bfloat16))
    assert jnp.allclose(out_bf_io.astype(jnp.float32), ref,
                        atol=1e-1, rtol=1e-1), "bf16-io path mismatch"

    print("KERNEL_OK")
</pallas_src>

<mosaic_0001>
module attributes {stable_mosaic.version = 11 : i64} {
  func.func @_bottleneck_kernel(%arg0: i32, %arg1: memref<1x8x8x128xf32, #tpu.memory_space<vmem>>, %arg2: memref<128x128xf32, #tpu.memory_space<vmem>>, %arg3: memref<1x128xf32, #tpu.memory_space<vmem>>, %arg4: memref<1152x128xf32, #tpu.memory_space<vmem>>, %arg5: memref<1x128xf32, #tpu.memory_space<vmem>>, %arg6: memref<128x128xf32, #tpu.memory_space<vmem>>, %arg7: memref<1x128xf32, #tpu.memory_space<vmem>>, %arg8: memref<1x8x8x128xf32, #tpu.memory_space<vmem>>, %arg9: memref<1x10x8x128xf32, #tpu.memory_space<vmem>>) attributes {dimension_semantics = [#tpu.dimension_semantics<parallel>], iteration_bounds = array<i64: 2>, scalar_prefetch = 0 : i64, scratch_operands = 1 : i64, tpu.core_type = #tpu.core_type<tc>, window_params = [{transform_indices = @transform_0, window_bounds = array<i64: 1, 8, 8, 128>}, {pipeline_mode = #tpu.pipeline_mode<synchronous>, transform_indices = @transform_1, window_bounds = array<i64: 128, 128>}, {pipeline_mode = #tpu.pipeline_mode<synchronous>, transform_indices = @transform_2, window_bounds = array<i64: 1, 128>}, {pipeline_mode = #tpu.pipeline_mode<synchronous>, transform_indices = @transform_3, window_bounds = array<i64: 1152, 128>}, {pipeline_mode = #tpu.pipeline_mode<synchronous>, transform_indices = @transform_4, window_bounds = array<i64: 1, 128>}, {pipeline_mode = #tpu.pipeline_mode<synchronous>, transform_indices = @transform_5, window_bounds = array<i64: 128, 128>}, {pipeline_mode = #tpu.pipeline_mode<synchronous>, transform_indices = @transform_6, window_bounds = array<i64: 1, 128>}, {transform_indices = @transform_7, window_bounds = array<i64: 1, 8, 8, 128>}]} {
    %c0 = arith.constant 0 : index
    %c0_0 = arith.constant 0 : index
    %c0_1 = arith.constant 0 : index
    %c0_2 = arith.constant 0 : index
    %0 = vector.load %arg1[%c0, %c0_0, %c0_1, %c0_2] : memref<1x8x8x128xf32, #tpu.memory_space<vmem>>, vector<1x8x8x128xf32>
    %1 = vector.shape_cast %0 : vector<1x8x8x128xf32> to vector<64x128xf32>
    %c0_3 = arith.constant 0 : index
    %c0_4 = arith.constant 0 : index
    %2 = vector.load %arg2[%c0_3, %c0_4] : memref<128x128xf32, #tpu.memory_space<vmem>>, vector<128x128xf32>
    %cst = arith.constant dense<0.000000e+00> : vector<64x128xf32>
    %3 = tpu.matmul %1, %2, %cst {dimension_numbers = #tpu.dot_dimension_numbers<[1], [0], [0], [1], [0, 0, 1, 1], [], []>} : vector<64x128xf32>, vector<128x128xf32>, vector<64x128xf32> -> vector<64x128xf32>
    %c0_5 = arith.constant 0 : index
    %c0_6 = arith.constant 0 : index
    %4 = vector.load %arg3[%c0_5, %c0_6] : memref<1x128xf32, #tpu.memory_space<vmem>>, vector<1x128xf32>
    %5 = vector.broadcast %4 : vector<1x128xf32> to vector<64x128xf32>
    %6 = arith.addf %3, %5 : vector<64x128xf32>
    %cst_7 = arith.constant 0.000000e+00 : f32
    %7 = vector.broadcast %cst_7 : f32 to vector<64x128xf32>
    %8 = arith.maximumf %6, %7 : vector<64x128xf32>
    %cst_8 = arith.constant 0.000000e+00 : f32
    %9 = vector.broadcast %cst_8 : f32 to vector<1x1x8x128xf32>
    %c0_9 = arith.constant 0 : index
    %c0_10 = arith.constant 0 : index
    %c0_11 = arith.constant 0 : index
    %c0_12 = arith.constant 0 : index
    %10 = vector.load %arg9[%c0_9, %c0_10, %c0_11, %c0_12] : memref<1x10x8x128xf32, #tpu.memory_space<vmem>>, vector<1x1x8x128xf32>
    tpu.vector_store %arg9[%c0_9, %c0_10, %c0_11, %c0_12], %9 {strides = array<i32>} : memref<1x10x8x128xf32, #tpu.memory_space<vmem>>, vector<1x1x8x128xf32>,
    %c0_13 = arith.constant 0 : index
    %c9 = arith.constant 9 : index
    %c0_14 = arith.constant 0 : index
    %c0_15 = arith.constant 0 : index
    %11 = vector.load %arg9[%c0_13, %c9, %c0_14, %c0_15] : memref<1x10x8x128xf32, #tpu.memory_space<vmem>>, vector<1x1x8x128xf32>
    tpu.vector_store %arg9[%c0_13, %c9, %c0_14, %c0_15], %9 {strides = array<i32>} : memref<1x10x8x128xf32, #tpu.memory_space<vmem>>, vector<1x1x8x128xf32>,
    %12 = vector.shape_cast %8 : vector<64x128xf32> to vector<1x8x8x128xf32>
    %c0_16 = arith.constant 0 : index
    %c1 = arith.constant 1 : index
    %c0_17 = arith.constant 0 : index
    %c0_18 = arith.constant 0 : index
    %13 = vector.load %arg9[%c0_16, %c1, %c0_17, %c0_18] : memref<1x10x8x128xf32, #tpu.memory_space<vmem>>, vector<1x8x8x128xf32>
    tpu.vector_store %arg9[%c0_16, %c1, %c0_17, %c0_18], %12 {strides = array<i32>} : memref<1x10x8x128xf32, #tpu.memory_space<vmem>>, vector<1x8x8x128xf32>,
    %14 = tpu.iota {dimensions = array<i32: 2>} : vector<1x8x8x128xi32>
    %c1_i32 = arith.constant 1 : i32
    %15 = vector.broadcast %c1_i32 : i32 to vector<1x8x8x128xi32>
    %16 = arith.cmpi sge, %14, %15 : vector<1x8x8x128xi32>
    %c7_i32 = arith.constant 7 : i32
    %17 = vector.broadcast %c7_i32 : i32 to vector<1x8x8x128xi32>
    %18 = arith.cmpi slt, %14, %17 : vector<1x8x8x128xi32>
    %cst_19 = arith.constant 0.000000e+00 : f32
    %19 = vector.broadcast %cst_19 : f32 to vector<64x128xf32>
    %c0_20 = arith.constant 0 : index
    %c0_21 = arith.constant 0 : index
    %c0_22 = arith.constant 0 : index
    %c0_23 = arith.constant 0 : index
    %20 = vector.load %arg9[%c0_20, %c0_21, %c0_22, %c0_23] : memref<1x10x8x128xf32, #tpu.memory_space<vmem>>, vector<1x8x8x128xf32>
    %c1_i32_24 = arith.constant 1 : i32
    %21 = tpu.dynamic_rotate %20 by %c1_i32_24 dim 2 : vector<1x8x8x128xf32>, i32 -> vector<1x8x8x128xf32>
    %cst_25 = arith.constant 0.000000e+00 : f32
    %22 = vector.broadcast %cst_25 : f32 to vector<1x8x8x128xf32>
    %23 = arith.select %16, %21, %22 : vector<1x8x8x128xi1>, vector<1x8x8x128xf32>
    %c7_i32_26 = arith.constant 7 : i32
    %24 = tpu.dynamic_rotate %20 by %c7_i32_26 dim 2 : vector<1x8x8x128xf32>, i32 -> vector<1x8x8x128xf32>
    %cst_27 = arith.constant 0.000000e+00 : f32
    %25 = vector.broadcast %cst_27 : f32 to vector<1x8x8x128xf32>
    %26 = arith.select %18, %24, %25 : vector<1x8x8x128xi1>, vector<1x8x8x128xf32>
    %27 = tpu.concatenate %23, %20, %26 in 3 : vector<1x8x8x128xf32>, vector<1x8x8x128xf32>, vector<1x8x8x128xf32> -> vector<1x8x8x384xf32>
    %28 = vector.shape_cast %27 : vector<1x8x8x384xf32> to vector<64x384xf32>
    %c0_28 = arith.constant 0 : index
    %c0_29 = arith.constant 0 : index
    %29 = vector.load %arg4[%c0_28, %c0_29] : memref<1152x128xf32, #tpu.memory_space<vmem>>, vector<384x128xf32>
    %cst_30 = arith.constant dense<0.000000e+00> : vector<64x128xf32>
    %30 = tpu.matmul %28, %29, %cst_30 {dimension_numbers = #tpu.dot_dimension_numbers<[1], [0], [0], [1], [0, 0, 1, 1], [], []>} : vector<64x384xf32>, vector<384x128xf32>, vector<64x128xf32> -> vector<64x128xf32>
    %31 = arith.addf %19, %30 : vector<64x128xf32>
    %c0_31 = arith.constant 0 : index
    %c1_32 = arith.constant 1 : index
    %c0_33 = arith.constant 0 : index
    %c0_34 = arith.constant 0 : index
    %32 = vector.load %arg9[%c0_31, %c1_32, %c0_33, %c0_34] : memref<1x10x8x128xf32, #tpu.memory_space<vmem>>, vector<1x8x8x128xf32>
    %c1_i32_35 = arith.constant 1 : i32
    %33 = tpu.dynamic_rotate %32 by %c1_i32_35 dim 2 : vector<1x8x8x128xf32>, i32 -> vector<1x8x8x128xf32>
    %cst_36 = arith.constant 0.000000e+00 : f32
    %34 = vector.broadcast %cst_36 : f32 to vector<1x8x8x128xf32>
    %35 = arith.select %16, %33, %34 : vector<1x8x8x128xi1>, vector<1x8x8x128xf32>
    %c7_i32_37 = arith.constant 7 : i32
    %36 = tpu.dynamic_rotate %32 by %c7_i32_37 dim 2 : vector<1x8x8x128xf32>, i32 -> vector<1x8x8x128xf32>
    %cst_38 = arith.constant 0.000000e+00 : f32
    %37 = vector.broadcast %cst_38 : f32 to vector<1x8x8x128xf32>
    %38 = arith.select %18, %36, %37 : vector<1x8x8x128xi1>, vector<1x8x8x128xf32>
    %39 = tpu.concatenate %35, %32, %38 in 3 : vector<1x8x8x128xf32>, vector<1x8x8x128xf32>, vector<1x8x8x128xf32> -> vector<1x8x8x384xf32>
    %40 = vector.shape_cast %39 : vector<1x8x8x384xf32> to vector<64x384xf32>
    %c384 = arith.constant 384 : index
    %c0_39 = arith.constant 0 : index
    %41 = vector.load %arg4[%c384, %c0_39] : memref<1152x128xf32, #tpu.memory_space<vmem>>, vector<384x128xf32>
    %cst_40 = arith.constant dense<0.000000e+00> : vector<64x128xf32>
    %42 = tpu.matmul %40, %41, %cst_40 {dimension_numbers = #tpu.dot_dimension_numbers<[1], [0], [0], [1], [0, 0, 1, 1], [], []>} : vector<64x384xf32>, vector<384x128xf32>, vector<64x128xf32> -> vector<64x128xf32>
    %43 = arith.addf %31, %42 : vector<64x128xf32>
    %c0_41 = arith.constant 0 : index
    %c2 = arith.constant 2 : index
    %c0_42 = arith.constant 0 : index
    %c0_43 = arith.constant 0 : index
    %44 = vector.load %arg9[%c0_41, %c2, %c0_42, %c0_43] : memref<1x10x8x128xf32, #tpu.memory_space<vmem>>, vector<1x8x8x128xf32>
    %c1_i32_44 = arith.constant 1 : i32
    %45 = tpu.dynamic_rotate %44 by %c1_i32_44 dim 2 : vector<1x8x8x128xf32>, i32 -> vector<1x8x8x128xf32>
    %cst_45 = arith.constant 0.000000e+00 : f32
    %46 = vector.broadcast %cst_45 : f32 to vector<1x8x8x128xf32>
    %47 = arith.select %16, %45, %46 : vector<1x8x8x128xi1>, vector<1x8x8x128xf32>
    %c7_i32_46 = arith.constant 7 : i32
    %48 = tpu.dynamic_rotate %44 by %c7_i32_46 dim 2 : vector<1x8x8x128xf32>, i32 -> vector<1x8x8x128xf32>
    %cst_47 = arith.constant 0.000000e+00 : f32
    %49 = vector.broadcast %cst_47 : f32 to vector<1x8x8x128xf32>
    %50 = arith.select %18, %48, %49 : vector<1x8x8x128xi1>, vector<1x8x8x128xf32>
    %51 = tpu.concatenate %47, %44, %50 in 3 : vector<1x8x8x128xf32>, vector<1x8x8x128xf32>, vector<1x8x8x128xf32> -> vector<1x8x8x384xf32>
    %52 = vector.shape_cast %51 : vector<1x8x8x384xf32> to vector<64x384xf32>
    %c768 = arith.constant 768 : index
    %c0_48 = arith.constant 0 : index
    %53 = vector.load %arg4[%c768, %c0_48] : memref<1152x128xf32, #tpu.memory_space<vmem>>, vector<384x128xf32>
    %cst_49 = arith.constant dense<0.000000e+00> : vector<64x128xf32>
    %54 = tpu.matmul %52, %53, %cst_49 {dimension_numbers = #tpu.dot_dimension_numbers<[1], [0], [0], [1], [0, 0, 1, 1], [], []>} : vector<64x384xf32>, vector<384x128xf32>, vector<64x128xf32> -> vector<64x128xf32>
    %55 = arith.addf %43, %54 : vector<64x128xf32>
    %c0_50 = arith.constant 0 : index
    %c0_51 = arith.constant 0 : index
    %56 = vector.load %arg5[%c0_50, %c0_51] : memref<1x128xf32, #tpu.memory_space<vmem>>, vector<1x128xf32>
    %57 = vector.broadcast %56 : vector<1x128xf32> to vector<64x128xf32>
    %58 = arith.addf %55, %57 : vector<64x128xf32>
    %cst_52 = arith.constant 0.000000e+00 : f32
    %59 = vector.broadcast %cst_52 : f32 to vector<64x128xf32>
    %60 = arith.maximumf %58, %59 : vector<64x128xf32>
    %c0_53 = arith.constant 0 : index
    %c0_54 = arith.constant 0 : index
    %61 = vector.load %arg6[%c0_53, %c0_54] : memref<128x128xf32, #tpu.memory_space<vmem>>, vector<128x128xf32>
    %cst_55 = arith.constant dense<0.000000e+00> : vector<64x128xf32>
    %62 = tpu.matmul %60, %61, %cst_55 {dimension_numbers = #tpu.dot_dimension_numbers<[1], [0], [0], [1], [0, 0, 1, 1], [], []>} : vector<64x128xf32>, vector<128x128xf32>, vector<64x128xf32> -> vector<64x128xf32>
    %c0_56 = arith.constant 0 : index
    %c0_57 = arith.constant 0 : index
    %63 = vector.load %arg7[%c0_56, %c0_57] : memref<1x128xf32, #tpu.memory_space<vmem>>, vector<1x128xf32>
    %64 = vector.broadcast %63 : vector<1x128xf32> to vector<64x128xf32>
    %65 = arith.addf %62, %64 : vector<64x128xf32>
    %c0_58 = arith.constant 0 : index
    %c0_59 = arith.constant 0 : index
    %c0_60 = arith.constant 0 : index
    %c0_61 = arith.constant 0 : index
    %66 = vector.load %arg1[%c0_58, %c0_59, %c0_60, %c0_61] : memref<1x8x8x128xf32, #tpu.memory_space<vmem>>, vector<1x8x8x128xf32>
    %67 = vector.shape_cast %66 : vector<1x8x8x128xf32> to vector<64x128xf32>
    %68 = arith.addf %65, %67 : vector<64x128xf32>
    %cst_62 = arith.constant 0.000000e+00 : f32
    %69 = vector.broadcast %cst_62 : f32 to vector<64x128xf32>
    %70 = arith.maximumf %68, %69 : vector<64x128xf32>
    %71 = vector.shape_cast %70 : vector<64x128xf32> to vector<1x8x8x128xf32>
    %c0_63 = arith.constant 0 : index
    %c0_64 = arith.constant 0 : index
    %c0_65 = arith.constant 0 : index
    %c0_66 = arith.constant 0 : index
    %72 = vector.load %arg8[%c0_63, %c0_64, %c0_65, %c0_66] : memref<1x8x8x128xf32, #tpu.memory_space<vmem>>, vector<1x8x8x128xf32>
    tpu.vector_store %arg8[%c0_63, %c0_64, %c0_65, %c0_66], %71 {strides = array<i32>} : memref<1x8x8x128xf32, #tpu.memory_space<vmem>>, vector<1x8x8x128xf32>,
    return
  }
  func.func @transform_0(%arg0: i32) -> (i32, i32, i32, i32) {
    %c0_i32 = arith.constant 0 : i32
    %c0_i32_0 = arith.constant 0 : i32
    %c0_i32_1 = arith.constant 0 : i32
    %c0_i32_2 = arith.constant 0 : i32
    return %arg0, %c0_i32, %c0_i32_0, %c0_i32_1 : i32, i32, i32, i32
  }
  func.func @transform_1(%arg0: i32) -> (i32, i32) {
    %c0_i32 = arith.constant 0 : i32
    %c0_i32_0 = arith.constant 0 : i32
    %c0_i32_1 = arith.constant 0 : i32
    return %c0_i32, %c0_i32_0 : i32, i32
  }
  func.func @transform_2(%arg0: i32) -> (i32, i32) {
    %c0_i32 = arith.constant 0 : i32
    %c0_i32_0 = arith.constant 0 : i32
    %c0_i32_1 = arith.constant 0 : i32
    return %c0_i32, %c0_i32_0 : i32, i32
  }
  func.func @transform_3(%arg0: i32) -> (i32, i32) {
    %c0_i32 = arith.constant 0 : i32
    %c0_i32_0 = arith.constant 0 : i32
    %c0_i32_1 = arith.constant 0 : i32
    return %c0_i32, %c0_i32_0 : i32, i32
  }
  func.func @transform_4(%arg0: i32) -> (i32, i32) {
    %c0_i32 = arith.constant 0 : i32
    %c0_i32_0 = arith.constant 0 : i32
    %c0_i32_1 = arith.constant 0 : i32
    return %c0_i32, %c0_i32_0 : i32, i32
  }
  func.func @transform_5(%arg0: i32) -> (i32, i32) {
    %c0_i32 = arith.constant 0 : i32
    %c0_i32_0 = arith.constant 0 : i32
    %c0_i32_1 = arith.constant 0 : i32
    return %c0_i32, %c0_i32_0 : i32, i32
  }
  func.func @transform_6(%arg0: i32) -> (i32, i32) {
    %c0_i32 = arith.constant 0 : i32
    %c0_i32_0 = arith.constant 0 : i32
    %c0_i32_1 = arith.constant 0 : i32
    return %c0_i32, %c0_i32_0 : i32, i32
  }
  func.func @transform_7(%arg0: i32) -> (i32, i32, i32, i32) {
    %c0_i32 = arith.constant 0 : i32
    %c0_i32_0 = arith.constant 0 : i32
    %c0_i32_1 = arith.constant 0 : i32
    %c0_i32_2 = arith.constant 0 : i32
    return %arg0, %c0_i32, %c0_i32_0, %c0_i32_1 : i32, i32, i32, i32
  }
}

</mosaic_0001>

<bundles_post_ra>
// kernel: tpu_custom_call.1
= control target key start
LH: loop header
LB: loop body
LE: loop exit
PB: predicated region body
PF: predicated region fallthrough
CT: control target
= control target key end

     0   :  { %12 = vsyncpa [#allocation4], 0  ;;  %s3480_s0 = inlined_call_operand.hbm [shape: f32[2,8,8,128], index: 0, kind: input, shape index: {}]   ;;  %s3481_s1 = inlined_call_operand.hbm [shape: f32[128,128], index: 1, kind: input, shape index: {}]   ;;  %s3482_s2 = inlined_call_operand.vmem [shape: f32[1,128], index: 2, kind: input, shape index: {}]   ;;  %s3483_s3 = inlined_call_operand.hbm [shape: f32[1152,128], index: 3, kind: input, shape index: {}]   ;;  %s3484_s4 = inlined_call_operand.vmem [shape: f32[1,128], index: 4, kind: input, shape index: {}]   ;;  %s3485_s5 = inlined_call_operand.hbm [shape: f32[128,128], index: 5, kind: input, shape index: {}]   ;;  %s3486_s6 = inlined_call_operand.vmem [shape: f32[1,128], index: 6, kind: input, shape index: {}]   ;;  %s3487_s7 = inlined_call_operand.hbm [shape: f32[2,8,8,128], index: 7, kind: output, shape index: {}]  }
   0x1   :  { %14 = vsyncpa [#allocation4 + $0x1], 0 }
   0x2   :  { %15 = vsyncpa [#allocation7], 0 }
   0x3   :  { %16 = vsyncpa [#allocation10], 0 }
   0x4   :  { %17 = vsyncpa [#allocation5], 0 }
   0x5   :  { %19 = vsyncpa [#allocation5 + $0x1], 0  ;;  %s2902_s24 = smov 0   ;;  %s2904_s25 = smov 0  }
   0x6   :  { %s2906_s26 = smov 0   ;;  %s2908_s27 = smov 0  }
   0x7 LB: > { %s2923_s28 = sadd.s32 4294967295, %s2850_s27   ;;  %s1703_s29 = sadd.s32 4294967294, %s2850_s27   ;;  %s2850_s27 = sphi %s2908_s27, %s3513_s27   ;;  %s2846_s26 = sphi %s2906_s26, %s3512_s26   ;;  %s2842_s25 = sphi %s2904_s25, %s3511_s25   ;;  %s2838_s24 = sphi %s2902_s24, %s3510_s24  }
   0x8   : > { %p45_p0 = scmp.ne.s32.totalorder %s2842_s25, %s2838_s24  ;;  %p3488_p1 = scmp.eq.s32.totalorder %s2923_s28, 0 }
   0x9   : > { %p201_p3 = scmp.eq.s32.totalorder %s1703_s29, 1  ;;  %p1704_p5 = scmp.ge.s32.totalorder %s2850_s27, 1 }
   0xa   : > { %p2932_p4 = por %p3488_p1, %p45_p0  ;;  %p208_p7 = scmp.lt.s32.totalorder %s2850_s27, 3 }
   0xb   : > { %p2937_p6 = por %p201_p3, %p45_p0  ;;  %s2852_s10 = smov [#allocation6]  }
   0xc   : > { %s3492_s30 = scalar_select %p2932_p4, 1, 0 }
   0xd   : > { %s3493_s8 = scalar_select %p2937_p6, 1, 0 }
   0xe   : > { %p2942_p8 = pnand %p1704_p5, %p208_p7  ;;  %s220_s11 = sshll.u32 %s2852_s10, 4  ;;  %s2946_s11 = int_to_ptr.vmem [resolvable:$true] %s220_s11 }
   0xf   : > { %3494 = sst [smem:[#allocation16_spill]] %s3493_s8  ;;  %s2853_s13 = smov [#allocation8]  }
  0x10   : > { %s3495_s9 = scalar_select %p2942_p8, 1, 0 }
  0x11   : > { %p2596_p9 = pneg %p2942_p8  ;;  %s236_s14 = sshll.u32 %s2853_s13, 4  ;;  %s2957_s14 = int_to_ptr.vmem [resolvable:$true] %s236_s14 }
  0x12   : > { %s2854_s15 = smov [#allocation9]   ;;  %s2662_s19 = scalar_lea.hbm %s3481_s1, 2048 }
  0x13   : > { %p2953_p11 = pnand %p2596_p9, %p3488_p1  ;;  %s2959_s16 = sshll.u32 %s2854_s15, 4  ;;  %s253_s16 = int_to_ptr.vmem [resolvable:$true] %s2959_s16 }
  0x14   : > { %p2663_p12 = scmp.ne.s32.totalorder %s3481_s1, %s2662_s19  ;;  %p2669_p5 = scmp.lt.u32.totalorder %s2662_s19, %s3481_s1 }
  0x15   : > { %p2969_p13 = pneg %p2953_p11 }
  0x17   : > { %p2665_p0 = pnand %p2969_p13, %p2663_p12 }
  0x19   : > { %p2666_p3 = pneg %p2665_p0 }
  0x1b   : > { %p2671_p7 = pnand %p2669_p5, %p2666_p3 }
  0x1d   : > { %2674 = shalt.err (!%p2671_p7)
}
  0x1e   : > { %s2675_s10 = scalar_lea.vmem %s2946_s11, 2048  ;;  %p2683_p2 = scmp.lt.s32.totalorder %s2946_s11, %s2946_s11 }
  0x1f   : > { %p2676_p9 = scmp.ne.s32.totalorder %s2946_s11, %s2675_s10  ;;  %p2684_p6 = scmp.lt.s32.totalorder %s2675_s10, %s2675_s10 }
  0x21   : > { %p2678_p10 = pnand %p2676_p9, %p2969_p13  ;;  %p2685_p12 = por %p2684_p6, %p2683_p2 }
  0x23   : > { %p2679_p1 = pneg %p2678_p10 }
  0x25   : > { %p2686_p0 = pnand %p2685_p12, %p2679_p1 }
  0x27   : > { %2689 = shalt.err (!%p2686_p0)
}
  0x28   : > { %s2855_s13 = smov 128   ;;  %s2856_s15 = smov 8  }
  0x29   : > { %2599 = dma.hbm_to_vmem [thread:$0]  (!%p2953_p11), %s3481_s1, 2048, %s2946_s11, [#allocation7], %s2855_s13, %s2855_s13, %s2856_s15  }
  0x2a   : > { %s2690_s21 = scalar_lea.hbm %s3483_s3, 18432 }
  0x2b   : > { %p2691_p1 = scmp.ne.s32.totalorder %s3483_s3, %s2690_s21  ;;  %p2697_p10 = scmp.lt.u32.totalorder %s2690_s21, %s3483_s3 }
  0x2d   : > { %p2693_p2 = pnand %p2691_p1, %p2969_p13 }
  0x2f   : > { %p2694_p6 = pneg %p2693_p2 }
  0x31   : > { %p2699_p3 = pnand %p2697_p10, %p2694_p6 }
  0x33   : > { %2702 = shalt.err (!%p2699_p3)
}
  0x34   : > { %s2703_s11 = scalar_lea.vmem %s2957_s14, 18432  ;;  %p2711_p12 = scmp.lt.s32.totalorder %s2957_s14, %s2957_s14 }
  0x35   : > { %p2704_p5 = scmp.ne.s32.totalorder %s2957_s14, %s2703_s11  ;;  %p2712_p0 = scmp.lt.s32.totalorder %s2703_s11, %s2703_s11 }
  0x37   : > { %p2706_p7 = pnand %p2704_p5, %p2969_p13  ;;  %p2713_p1 = por %p2712_p0, %p2711_p12 }
  0x39   : > { %p2707_p9 = pneg %p2706_p7 }
  0x3b   : > { %p2714_p2 = pnand %p2713_p1, %p2707_p9 }
  0x3d   : > { %2717 = shalt.err (!%p2714_p2)
}
  0x3e   : > { %2602 = dma.hbm_to_vmem [thread:$0]  (!%p2953_p11), %s3483_s3, 18432, %s2957_s14, [#allocation7], %s2855_s13, %s2855_s13, %s2856_s15  }
  0x3f   : > { %s2718_s20 = scalar_lea.hbm %s3485_s5, 2048 }
  0x40   : > { %p2719_p6 = scmp.ne.s32.totalorder %s3485_s5, %s2718_s20  ;;  %p2725_p5 = scmp.lt.u32.totalorder %s2718_s20, %s3485_s5 }
  0x42   : > { %p2721_p10 = pnand %p2719_p6, %p2969_p13 }
  0x44   : > { %p2722_p3 = pneg %p2721_p10 }
  0x46   : > { %p2727_p7 = pnand %p2725_p5, %p2722_p3 }
  0x48   : > { %2730 = shalt.err (!%p2727_p7)
}
  0x49   : > { %s2731_s11 = scalar_lea.vmem %s253_s16, 2048  ;;  %p2739_p1 = scmp.lt.s32.totalorder %s253_s16, %s253_s16 }
  0x4a   : > { %p2732_p9 = scmp.ne.s32.totalorder %s253_s16, %s2731_s11  ;;  %p2740_p2 = scmp.lt.s32.totalorder %s2731_s11, %s2731_s11 }
  0x4c   : > { %p2734_p12 = pnand %p2732_p9, %p2969_p13  ;;  %p2741_p4 = por %p2740_p2, %p2739_p1 }
  0x4e   : > { %p2735_p0 = pneg %p2734_p12 }
  0x50   : > { %p2742_p8 = pnand %p2741_p4, %p2735_p0 }
  0x52   : > { %2745 = shalt.err (!%p2742_p8)
}
  0x53   : > { %2605 = dma.hbm_to_vmem [thread:$0]  (!%p2953_p11), %s3485_s5, 2048, %s253_s16, [#allocation10], %s2855_s13, %s2855_s13, %s2856_s15  }
  0x54   : > { %s3042_s22 = sadd.s32 1, %s2850_s27   ;;  %s32_s17 = sadd.s32 1, %s2846_s26 }
  0x55   : > { %s29_s12 = ssub.s32 %s2850_s27, %s3042_s22  ;;  %p39_p8 = scmp.ne.s32.totalorder %s2846_s26, %s2842_s25 }
  0x56   : > { %p30_p4 = scmp.eq.s32.totalorder %s29_s12, 0  ;;  %p40_p13 = scmp.eq.s32.totalorder %s2850_s27, 0 }
  0x57   : > { %p2617_p6 = scmp.lt.s32.totalorder %s2850_s27, 2  ;;  %p3498_p3 = scmp.eq.s32.totalorder %s2923_s28, 1 }
  0x58   : > { %s3052_s18 = scalar_select %p30_p4, %s2846_s26, %s32_s17  }
  0x59   : > { %p41_p10 = por %p40_p13, %p39_p8  ;;  %p3056_p5 = por %p3498_p3, %p39_p8 }
  0x5a   : > { %s269_s20 = sand.u32 1, %s2846_s26   ;;  %s1774_s21 = sshll.u32 %s2850_s27, 10 }
  0x5b   : > { %s1709_s16 = sshll.u32 %s269_s20, 6  ;;  %s3065_s10 = scalar_lea.hbm %s3480_s0, %s1774_s21 }
  0x5c   : > { %s273_s11 = scalar_lea.vmem [#allocation3], %s1709_s16  ;;  %p3067_p11 = pnand %p2617_p6, %p41_p10 }
  0x5d   : > { %s280_s14 = sshll.u32 %s273_s11, 4  ;;  %s3073_s12 = scalar_lea.sflag [#allocation4], %s269_s20  ;;  %s3071_s14 = int_to_ptr.vmem [resolvable:$true] %s280_s14 }
  0x5e   : > { %s2746_s17 = scalar_lea.hbm %s3065_s10, 1024  ;;  %p2748_p9 = pneg %p3067_p11 }
  0x5f   : > { %p2747_p7 = scmp.ne.s32.totalorder %s3065_s10, %s2746_s17  ;;  %s2751_s23 = scalar_lea.hbm %s3480_s0, 2048 }
  0x60   : > { %p2752_p1 = scmp.lt.u32.totalorder %s3065_s10, %s3480_s0  ;;  %p2753_p2 = scmp.lt.u32.totalorder %s2751_s23, %s2746_s17 }
  0x61   : > { %p2749_p12 = pnand %p2748_p9, %p2747_p7  ;;  %p2755_p8 = scmp.lt.u32.totalorder %s2746_s17, %s3065_s10 }
  0x62   : > { %p2754_p4 = por %p2753_p2, %p2752_p1 }
  0x63   : > { %p2750_p0 = pneg %p2749_p12 }
  0x64   : > { %p2756_p13 = por %p2755_p8, %p2754_p4 }
  0x66   : > { %p2757_p6 = pnand %p2756_p13, %p2750_p0 }
  0x68   : > { %2760 = shalt.err (!%p2757_p6)
}
  0x69   : > { %s2761_s20 = scalar_lea.vmem %s3071_s14, 1024  ;;  %s2857_s21 = smov [#allocation3]  }
  0x6a   : > { %p2762_p10 = scmp.ne.s32.totalorder %s3071_s14, %s2761_s20  ;;  %s2766_s16 = sshll.u32 %s2857_s21, 4  ;;  %s2767_s16 = int_to_ptr.vmem [resolvable:$false] %s2766_s16 }
  0x6b   : > { %s2768_s29 = scalar_lea.vmem %s2767_s16, 2048  ;;  %p2769_p12 = scmp.lt.s32.totalorder %s3071_s14, %s2767_s16 }
  0x6c   : > { %p2764_p3 = pnand %p2762_p10, %p2748_p9  ;;  %p2770_p1 = scmp.lt.s32.totalorder %s2768_s29, %s2761_s20 }
  0x6e   : > { %p2765_p7 = pneg %p2764_p3  ;;  %p2771_p2 = por %p2770_p1, %p2769_p12 }
  0x70   : > { %p2772_p4 = pnand %p2771_p2, %p2765_p7 }
  0x72   : > { %2775 = shalt.err (!%p2772_p4)
}
  0x73   : > { %2609 = dma.hbm_to_vmem [thread:$0]  (!%p3067_p11), %s3065_s10, 1024, %s3071_s14, %s3073_s12, %s2855_s13, %s2855_s13, %s2856_s15  }
  0x74   : > { %p3501_p9 = scmp.ne.s32.totalorder %s3495_s9, 0 }
  0x75   : > { %s3107_s17 = sand.u32 (!%p3501_p9), 1, %s2842_s25   ;;  %p3502_p0 = scmp.ne.s32.totalorder (!%p3501_p9), %s3492_s30, 0 }
  0x76   : > { %292 = sbr.rel (%p3501_p9) target bundleno = 936 (0x3a8), region = 48  ;;  %s1713_s23 = sshll.u32 (!%p3501_p9), %s3107_s17, 6 }
  0x77   : > { %s295_s11 = scalar_lea.sflag (!%p3501_p9), [#allocation4], %s3107_s17  ;;  %s3113_s8 = scalar_lea.vmem (!%p3501_p9), [#allocation3], %s1713_s23 }
  0x7d   : > { %2821 = dma.done.wait (%p3502_p0), %s295_s11, 1024  }
  0x7e   : > { %2823 = vsyncadd (%p3502_p0), %s295_s11, 4294966272  ;;  %p3503_p11 = scmp.eq.s32.totalorder %s2923_s28, 0 }
  0x80   : > { %2825 = dma.done.wait (%p3503_p11), [#allocation7], 20480   ;;  %p3504_p8 = pmov %p3503_p11 }
  0x82   : > { %2827 = vsyncadd (%p3504_p8), [#allocation7], 4294946816  ;;  %p3505_p13 = pmov %p3504_p8 }
  0x83   : > { %p3506_p6 = pmov %p3504_p8 }
  0x84   : > { %2829 = dma.done.wait (%p3505_p13), [#allocation10], 2048  }
  0x85   : > { %2831 = vsyncadd (%p3506_p6), [#allocation10], 4294965248  ;;  %v349_v0 = vld [vmem:[#allocation6] sm:$0xff]  ;;  %v350_v1 = vld [vmem:[#allocation6 + $0x8] sm:$0xff]  ;;  %s3413_s12 = scalar_lea.vmem [#allocation11], %s1713_s23  ;;  %s1775_s21 = sshll.u32 %s2923_s28, 10 }
  0x86   : > { %v351_v2 = vld [vmem:[#allocation6 + $0x10] sm:$0xff]  ;;  %v2284_v3 = vpack.c.bf16 %v350_v1, %v349_v0  ;;  %v352_v4 = vld [vmem:[#allocation6 + $0x18] sm:$0xff]  ;;  %v353_v6 = vld [vmem:[#allocation6 + $0x20] sm:$0xff]  ;;  %s1601_s20 = sshll.u32 %s3413_s12, 4  ;;  %s3434_s23 = scalar_lea.hbm %s3487_s7, %s1775_s21  ;;  %s3429_s20 = int_to_ptr.vmem [resolvable:$true] %s1601_s20 }
  0x87   : > { %v2288_v5 = vpack.c.bf16 %v352_v4, %v351_v2  ;;  %v354_v7 = vld [vmem:[#allocation6 + $0x28] sm:$0xff]  ;;  %v341_v9 = vld [vmem:[%s3113_s8] sm:$0xff]  ;;  %v355_v10 = vld [vmem:[#allocation6 + $0x30] sm:$0xff]  ;;  %s1588_s11 = scalar_lea.sflag [#allocation5], %s3107_s17  ;;  %s2859_s28 = smov [#allocation11]  }
  0x88   : > { %2285 = vmatprep.subr.bf16.mxu0 %v2284_v3  ;;  %v2292_v8 = vpack.c.bf16 %v354_v7, %v353_v6  ;;  %v356_v11 = vld [vmem:[#allocation6 + $0x38] sm:$0xff]  ;;  %2096 = vmatprep.mubr.f32.mxu0 %v341_v9  ;;  %v645_v12 = vld [vmem:[#allocation8 + $0x200] sm:$0xff]  ;;  %v646_v13 = vld [vmem:[#allocation8 + $0x208] sm:$0xff]  ;;  %s2780_s30 = sshll.u32 %s2859_s28, 4  ;;  %s2781_s30 = int_to_ptr.vmem [resolvable:$false] %s2780_s30 }
  0x89   : > { %2287 = vmatpush3.bf16.msra.mxu0 %v2284_v3  ;;  %v629_v14 = vld [vmem:[#allocation8 + $0x180] sm:$0xff]  ;;  %v2296_v15 = vpack.c.bf16 %v356_v11, %v355_v10  ;;  %v358_v17 = vld [vmem:[#allocation6 + $0x48] sm:$0xff]  ;;  %v2316_v18 = vpack.c.bf16 %v646_v13, %v645_v12  ;;  %v647_v21 = vld [vmem:[#allocation8 + $0x210] sm:$0xff]  ;;  %s2782_s9 = scalar_lea.vmem %s2781_s30, 2048  ;;  %p2783_p12 = scmp.lt.s32.totalorder %s3429_s20, %s2781_s30 }
  0x8a   : > { %2289 = vmatprep.subr.bf16.mxu0 %v2288_v5  ;;  %v357_v16 = vld [vmem:[#allocation6 + $0x40] sm:$0xff]  ;;  %v630_v19 = vld [vmem:[#allocation8 + $0x188] sm:$0xff]  ;;  %v648_v22 = vld [vmem:[#allocation8 + $0x218] sm:$0xff] }
  0x8b   : > { %v2318_v20 = vpack.c.bf16 %v630_v19, %v629_v14  ;;  %v631_v23 = vld [vmem:[#allocation8 + $0x190] sm:$0xff]  ;;  %2317 = vmatprep.subr.bf16.mxu1 %v2316_v18  ;;  %v2320_v24 = vpack.c.bf16 %v648_v22, %v647_v21  ;;  %v632_v25 = vld [vmem:[#allocation8 + $0x198] sm:$0xff]  ;;  %v649_v27 = vld [vmem:[#allocation8 + $0x220] sm:$0xff]  ;;  %v2300_v29 = vpack.c.bf16 %v358_v17, %v357_v16 }
  0x8c   : > { %v2322_v26 = vpack.c.bf16 %v632_v25, %v631_v23  ;;  %v650_v28 = vld [vmem:[#allocation8 + $0x228] sm:$0xff]  ;;  %v359_v30 = vld [vmem:[#allocation6 + $0x50] sm:$0xff]  ;;  %v633_v32 = vld [vmem:[#allocation8 + $0x1a0] sm:$0xff] }
  0x8d   : > { %2291 = vmatpush3.bf16.msra.mxu0 %v2288_v5  ;;  %2319 = vmatpush3.bf16.msra.mxu1 %v2318_v20  ;;  %v2324_v31 = vpack.c.bf16 %v650_v28, %v649_v27  ;;  %v634_v33 = vld [vmem:[#allocation8 + $0x1a8] sm:$0xff]  ;;  %v360_v34 = vld [vmem:[#allocation6 + $0x58] sm:$0xff]  ;;  %v651_v35 = vld [vmem:[#allocation8 + $0x230] sm:$0xff] }
  0x8e   : > { %2293 = vmatprep.subr.bf16.mxu0 %v2292_v8  ;;  %2321 = vmatprep.subr.bf16.mxu1 %v2320_v24  ;;  %v652_v36 = vld [vmem:[#allocation8 + $0x238] sm:$0xff]  ;;  %v2326_v37 = vpack.c.bf16 %v634_v33, %v633_v32  ;;  %v2304_v38 = vpack.c.bf16 %v360_v34, %v359_v30  ;;  %v361_v39 = vld [vmem:[#allocation6 + $0x60] sm:$0xff]  ;;  %v635_v41 = vld [vmem:[#allocation8 + $0x1b0] sm:$0xff] }
  0x8f   : > { %v2328_v40 = vpack.c.bf16 %v652_v36, %v651_v35  ;;  %v636_v42 = vld [vmem:[#allocation8 + $0x1b8] sm:$0xff]  ;;  %v362_v43 = vld [vmem:[#allocation6 + $0x68] sm:$0xff]  ;;  %v653_v44 = vld [vmem:[#allocation8 + $0x240] sm:$0xff] }
  0x90   : > { %v654_v45 = vld [vmem:[#allocation8 + $0x248] sm:$0xff]  ;;  %v2330_v46 = vpack.c.bf16 %v636_v42, %v635_v41  ;;  %v2308_v47 = vpack.c.bf16 %v362_v43, %v361_v39  ;;  %v363_v48 = vld [vmem:[#allocation6 + $0x70] sm:$0xff]  ;;  %v637_v50 = vld [vmem:[#allocation8 + $0x1c0] sm:$0xff] }
  0x91   : > { %2295 = vmatpush3.bf16.msra.mxu0 %v2292_v8  ;;  %2323 = vmatpush3.bf16.msra.mxu1 %v2322_v26  ;;  %v2332_v49 = vpack.c.bf16 %v654_v45, %v653_v44  ;;  %v638_v51 = vld [vmem:[#allocation8 + $0x1c8] sm:$0xff]  ;;  %v364_v52 = vld [vmem:[#allocation6 + $0x78] sm:$0xff]  ;;  %v655_v53 = vld [vmem:[#allocation8 + $0x250] sm:$0xff] }
  0x92   : > { %2297 = vmatprep.subr.bf16.mxu0 %v2296_v15  ;;  %2325 = vmatprep.subr.bf16.mxu1 %v2324_v31  ;;  %v656_v54 = vld [vmem:[#allocation8 + $0x258] sm:$0xff]  ;;  %v2334_v55 = vpack.c.bf16 %v638_v51, %v637_v50  ;;  %v2312_v56 = vpack.c.bf16 %v364_v52, %v363_v48  ;;  %v661_v57 = vld [vmem:[#allocation8 + $0x280] sm:$0xff]  ;;  %v639_v59 = vld [vmem:[#allocation8 + $0x1d0] sm:$0xff] }
  0x93   : > { %v2336_v58 = vpack.c.bf16 %v656_v54, %v655_v53  ;;  %v640_v60 = vld [vmem:[#allocation8 + $0x1d8] sm:$0xff]  ;;  %v662_v61 = vld [vmem:[#allocation8 + $0x288] sm:$0xff]  ;;  %v657_v62 = vld [vmem:[#allocation8 + $0x260] sm:$0xff] }
  0x94   : > { %v658_v63 = vld [vmem:[#allocation8 + $0x268] sm:$0xff]  ;;  %v2338_v0 = vpack.c.bf16 %v640_v60, %v639_v59  ;;  %v2348_v1 = vpack.c.bf16 %v662_v61, %v661_v57  ;;  %v663_v3 = vld [vmem:[#allocation8 + $0x290] sm:$0xff]  ;;  %v664_v4 = vld [vmem:[#allocation8 + $0x298] sm:$0xff] }
  0x95   : > { %2299 = vmatpush3.bf16.msra.mxu0 %v2296_v15  ;;  %2327 = vmatpush3.bf16.msra.mxu1 %v2326_v37  ;;  %v2340_v2 = vpack.c.bf16 %v658_v63, %v657_v62  ;;  %v342_v5 = vld [vmem:[%s3113_s8 + $0x8] sm:$0xff]  ;;  %v343_v6 = vld [vmem:[%s3113_s8 + $0x10] sm:$0xff]  ;;  %v2352_v7 = vpack.c.bf16 %v664_v4, %v663_v3  ;;  %v665_v8 = vld [vmem:[#allocation8 + $0x2a0] sm:$0xff] }
  0x96   : > { %2301 = vmatprep.subr.bf16.mxu0 %v2300_v29  ;;  %2329 = vmatprep.subr.bf16.mxu1 %v2328_v40  ;;  %v666_v9 = vld [vmem:[#allocation8 + $0x2a8] sm:$0xff]  ;;  %v344_v10 = vld [vmem:[%s3113_s8 + $0x18] sm:$0xff]  ;;  %v345_v11 = vld [vmem:[%s3113_s8 + $0x20] sm:$0xff] }
  0x97   : > { %v2356_v12 = vpack.c.bf16 %v666_v9, %v665_v8  ;;  %v667_v13 = vld [vmem:[#allocation8 + $0x2b0] sm:$0xff]  ;;  %v668_v14 = vld [vmem:[#allocation8 + $0x2b8] sm:$0xff]  ;;  %v346_v15 = vld [vmem:[%s3113_s8 + $0x28] sm:$0xff] }
  0x98   : > { %v347_v16 = vld [vmem:[%s3113_s8 + $0x30] sm:$0xff]  ;;  %v2360_v17 = vpack.c.bf16 %v668_v14, %v667_v13  ;;  %v669_v18 = vld [vmem:[#allocation8 + $0x2c0] sm:$0xff]  ;;  %v670_v19 = vld [vmem:[#allocation8 + $0x2c8] sm:$0xff] }
  0x99   : > { %2303 = vmatpush3.bf16.msra.mxu0 %v2300_v29  ;;  %2331 = vmatpush3.bf16.msra.mxu1 %v2330_v46  ;;  %v348_v20 = vld [vmem:[%s3113_s8 + $0x38] sm:$0xff]  ;;  %v2364_v21 = vpack.c.bf16 %v670_v19, %v669_v18  ;;  %v671_v22 = vld [vmem:[#allocation8 + $0x2d0] sm:$0xff]  ;;  %v673_v25 = vld [vmem:[#allocation8 + $0x2e0] sm:$0xff]  ;;  %v497_v46 = vlaneseq }
  0x9a   : > { %2305 = vmatprep.subr.bf16.mxu0 %v2304_v38  ;;  %2333 = vmatprep.subr.bf16.mxu1 %v2332_v49  ;;  %v672_v23 = vld [vmem:[#allocation8 + $0x2d8] sm:$0xff]  ;;  %v674_v26 = vld [vmem:[#allocation8 + $0x2e8] sm:$0xff]  ;;  %v641_v27 = vld [vmem:[#allocation8 + $0x1e0] sm:$0xff] }
  0x9b   : > { %v2368_v24 = vpack.c.bf16 %v672_v23, %v671_v22  ;;  %v642_v28 = vld [vmem:[#allocation8 + $0x1e8] sm:$0xff]  ;;  %v2372_v29 = vpack.c.bf16 %v674_v26, %v673_v25  ;;  %v659_v31 = vld [vmem:[#allocation8 + $0x270] sm:$0xff]  ;;  %v660_v32 = vld [vmem:[#allocation8 + $0x278] sm:$0xff]  ;;  %v3141_v51 = vshrl.u32 %v497_v46, 7 }
  0x9c   : > { %v2342_v30 = vpack.c.bf16 %v642_v28, %v641_v27  ;;  %v675_v33 = vld [vmem:[#allocation8 + $0x2f0] sm:$0xff]  ;;  %v2344_v34 = vpack.c.bf16 %v660_v32, %v659_v31  ;;  %v644_v36 = vld [vmem:[#allocation8 + $0x1f8] sm:$0xff]  ;;  %v557_v40 = vld [vmem:[#allocation8 + $0x80] sm:$0xff] }
  0x9d   : > { %2307 = vmatpush3.bf16.msra.mxu0 %v2304_v38  ;;  %2335 = vmatpush3.bf16.msra.mxu1 %v2334_v55  ;;  %v643_v35 = vld [vmem:[#allocation8 + $0x1f0] sm:$0xff]  ;;  %v676_v37 = vld [vmem:[#allocation8 + $0x2f8] sm:$0xff]  ;;  %v558_v41 = vld [vmem:[#allocation8 + $0x88] sm:$0xff]  ;;  %vm499_vm0 = vcmp.ge.s32.totalorder %v3141_v51, 1  ;;  %vm500_vm1 = vcmp.lt.s32.totalorder %v3141_v51, 7 }
  0x9e   : > { %2309 = vmatprep.subr.bf16.mxu0 %v2308_v47  ;;  %2337 = vmatprep.subr.bf16.mxu1 %v2336_v58  ;;  %v2346_v38 = vpack.c.bf16 %v644_v36, %v643_v35  ;;  %v2376_v39 = vpack.c.bf16 %v676_v37, %v675_v33  ;;  %v573_v42 = vld [vmem:[#allocation8 + $0x100] sm:$0xff]  ;;  %v2380_v43 = vpack.c.bf16 %v558_v41, %v557_v40  ;;  %v574_v44 = vld [vmem:[#allocation8 + $0x108] sm:$0xff]  ;;  %v559_v55 = vld [vmem:[#allocation8 + $0x90] sm:$0xff] }
  0x9f   : > { %v2412_v45 = vpack.c.bf16 %v574_v44, %v573_v42  ;;  %v541_v53 = vld [vmem:[#allocation8] sm:$0xff]  ;;  %v542_v54 = vld [vmem:[#allocation8 + $0x8] sm:$0xff]  ;;  %v543_v63 = vld [vmem:[#allocation8 + $0x10] sm:$0xff] }
  0xa0   : > { %v2382_v62 = vpack.c.bf16 %v542_v54, %v541_v53  ;;  %v562_v8 = vld [vmem:[#allocation8 + $0xa8] sm:$0xff]  ;;  %v545_v22 = vld [vmem:[#allocation8 + $0x20] sm:$0xff]  ;;  %v563_v25 = vld [vmem:[#allocation8 + $0xb0] sm:$0xff] }
  0xa1   : > { %2311 = vmatpush3.bf16.msra.mxu0 %v2308_v47  ;;  %2339 = vmatpush3.bf16.msra.mxu1 %v2338_v0  ;;  %v3138_v47 = vld [vmem:[%s3482_s2] ss:$0 sm:$0xff]  ;;  %v575_v0 = vld [vmem:[#allocation8 + $0x110] sm:$0xff]  ;;  %v546_v23 = vld [vmem:[#allocation8 + $0x28] sm:$0xff] }
  0xa2   : > { %2313 = vmatprep.subr.bf16.mxu0 %v2312_v56  ;;  %2341 = vmatprep.subr.bf16.mxu1 %v2340_v2  ;;  %v564_v26 = vld [vmem:[#allocation8 + $0xb8] sm:$0xff]  ;;  %v2390_v31 = vpack.c.bf16 %v546_v23, %v545_v22  ;;  %v579_v33 = vld [vmem:[#allocation8 + $0x130] sm:$0xff]  ;;  %v566_v44 = vld [vmem:[#allocation8 + $0xc8] sm:$0xff] }
  0xa3   : > { %v2392_v37 = vpack.c.bf16 %v564_v26, %v563_v25  ;;  %v554_v25 = vld [vmem:[#allocation8 + $0x68] sm:$0xff]  ;;  %v571_v26 = vld [vmem:[#allocation8 + $0xf0] sm:$0xff]  ;;  %v1435_v51 = vld [vmem:[#allocation9 + $0x40] sm:$0xff] }
  0xa5   : > { %2315 = vmatpush3.bf16.msra.mxu0 %v2312_v56  ;;  %2343 = vmatpush3.bf16.msra.mxu1 %v2342_v30  ;;  %v560_v56 = vld [vmem:[#allocation8 + $0x98] sm:$0xff] }
  0xa6   : > { %2349 = vmatprep.subr.bf16.mxu0 %v2348_v1  ;;  %2345 = vmatprep.subr.bf16.mxu1 %v2344_v34  ;;  %v580_v34 = vld [vmem:[#allocation8 + $0x138] sm:$0xff] }
  0xa8   : > { %2097 = vmatmul.mubr.f32.vlgmr.msra.gmra.mrb[0].mxu0 %v342_v5  ;;  %v2384_v5 = vpack.c.bf16 %v560_v56, %v559_v55  ;;  %v549_v55 = vld [vmem:[#allocation8 + $0x40] sm:$0xff]  ;;  %v550_v56 = vld [vmem:[#allocation8 + $0x48] sm:$0xff] }
  0xa9   : > { %2099 = vmatprep.mubr.f32.mxu0 %v343_v6  ;;  %2351 = vmatpush3.bf16.msra.mxu0 %v2348_v1  ;;  %v576_v1 = vld [vmem:[#allocation8 + $0x118] sm:$0xff] }
  0xaa   : > { %2353 = vmatprep.subr.bf16.mxu0 %v2352_v7  ;;  %2347 = vmatpush3.bf16.msra.mxu1 %v2346_v38  ;;  %v544_v6 = vld [vmem:[#allocation8 + $0x18] sm:$0xff]  ;;  %v547_v38 = vld [vmem:[#allocation8 + $0x30] sm:$0xff] }
  0xab   : > { %2381 = vmatprep.subr.bf16.mxu1 %v2380_v43  ;;  %v2386_v14 = vpack.c.bf16 %v544_v6, %v543_v63  ;;  %v565_v43 = vld [vmem:[#allocation8 + $0xc0] sm:$0xff]  ;;  %v551_v6 = vld [vmem:[#allocation8 + $0x50] sm:$0xff] }
  0xac   : > { %2100 = vmatmul.mubr.f32.gmra.mrb[2].mxu0 %v344_v10  ;;  %v2396_v54 = vpack.c.bf16 %v566_v44, %v565_v43 }
  0xad   : > { %2102 = vmatprep.mubr.f32.mxu0 %v345_v11  ;;  %2355 = vmatpush3.bf16.msra.mxu0 %v2352_v7  ;;  %v561_v7 = vld [vmem:[#allocation8 + $0xa0] sm:$0xff] }
  0xae   : > { %2357 = vmatprep.subr.bf16.mxu0 %v2356_v12 }
  0xb0   : > { %2103 = vmatmul.mubr.f32.gmra.mrb[4].mxu0 %v346_v15 }
  0xb1   : > { %2105 = vmatprep.mubr.f32.mxu0 %v347_v16  ;;  %2359 = vmatpush3.bf16.msra.mxu0 %v2356_v12  ;;  %v2416_v12 = vpack.c.bf16 %v576_v1, %v575_v0  ;;  %v2388_v16 = vpack.c.bf16 %v562_v8, %v561_v7  ;;  %v2398_v0 = vpack.c.bf16 %v550_v56, %v549_v55  ;;  %v583_v1 = vld [vmem:[#allocation8 + $0x150] sm:$0xff]  ;;  %v552_v7 = vld [vmem:[#allocation8 + $0x58] sm:$0xff]  ;;  %v1139_v55 = vld [vmem:[#allocation8 + $0x308] sm:$0xff] }
  0xb2   : > { %2361 = vmatprep.subr.bf16.mxu0 %v2360_v17  ;;  %v1156_v56 = vld [vmem:[#allocation8 + $0x390] sm:$0xff] }
  0xb4   : > { %2106 = vmatmul.mubr.f32.gmra.mrb[6].mxu0 %v348_v20 }
  0xb5   : > { %2363 = vmatpush3.bf16.msra.mxu0 %v2360_v17  ;;  %v577_v17 = vld [vmem:[#allocation8 + $0x120] sm:$0xff] }
  0xb6   : > { %2365 = vmatprep.subr.bf16.mxu0 %v2364_v21 }
  0xb9   : > { %2367 = vmatpush3.bf16.msra.mxu0 %v2364_v21 }
  0xba   : > { %2369 = vmatprep.subr.bf16.mxu0 %v2368_v24 }
  0xbd   : > { %2371 = vmatpush3.bf16.msra.mxu0 %v2368_v24  ;;  %v578_v24 = vld [vmem:[#allocation8 + $0x128] sm:$0xff] }
  0xbe   : > { %2373 = vmatprep.subr.bf16.mxu0 %v2372_v29  ;;  %v2420_v32 = vpack.c.bf16 %v578_v24, %v577_v17  ;;  %v2402_v17 = vpack.c.bf16 %v552_v7, %v551_v6  ;;  %v553_v24 = vld [vmem:[#allocation8 + $0x60] sm:$0xff]  ;;  %v1140_v6 = vld [vmem:[#allocation8 + $0x310] sm:$0xff]  ;;  %v1141_v7 = vld [vmem:[#allocation8 + $0x318] sm:$0xff] }
  0xc1   : > { %2375 = vmatpush3.bf16.msra.mxu0 %v2372_v29 }
  0xc2   : > { %2377 = vmatprep.subr.bf16.mxu0 %v2376_v39 }
  0xc5   : > { %2379 = vmatpush3.bf16.msra.mxu0 %v2376_v39  ;;  %v548_v39 = vld [vmem:[#allocation8 + $0x38] sm:$0xff] }
  0xc6   : > { %2413 = vmatprep.subr.bf16.mxu0 %v2412_v45 }
 0x17b   : > { %v2098_v48 = vpop.f32.mrb[0].mxu0 }
 0x17c   : > { %v444_v49 = vadd.f32 %v2098_v48, %v3138_v47  ;;  %v438_v50 = vpop.f32.mrb[1].mxu0  ;;  %v581_v48 = vld [vmem:[#allocation8 + $0x140] sm:$0xff] }
 0x17d   : > { %v439_v52 = vadd.f32 %v3138_v47, %v438_v50 }
 0x17e   : > { %v3144_v57 = vmax.f32 %v444_v49, 0.0  ;;  %v582_v49 = vld [vmem:[#allocation8 + $0x148] sm:$0xff] }
 0x17f   : > { %v3146_v58 = vmax.f32 %v439_v52, 0.0  ;;  %v2101_v59 = vpop.f32.mrb[2].mxu0  ;;  %v2428_v63 = vpack.c.bf16 %v582_v49, %v581_v48 }
 0x180   : > { %v454_v60 = vadd.f32 %v2101_v59, %v3138_v47  ;;  %v448_v61 = vpop.f32.mrb[3].mxu0  ;;  %v3156_v9 = vrot.slane %v3144_v57, 1  ;;  %v3175_v18 = vrot.slane %v3144_v57, 7  ;;  %v567_v59 = vld [vmem:[#allocation8 + $0xd0] sm:$0xff] }
 0x181   : > { %741 = vmatprep.mubr.f32.mxu1 %v3146_v58  ;;  %v449_v2 = vadd.f32 %v3138_v47, %v448_v61  ;;  %v510_v3 = vrot.slane %v3146_v58, 7  ;;  %v526_v4 = vrot.slane %v3146_v58, 1 }
 0x182   : > { %v3158_v10 = vmax.f32 %v454_v60, 0.0  ;;  %v568_v60 = vld [vmem:[#allocation8 + $0xd8] sm:$0xff] }
 0x183   : > { %v3160_v11 = vmax.f32 %v449_v2, 0.0  ;;  %1719 = vmatmul.mubr.msk.f32.vlgmr.msra.gmra.mrb[0].mxu1 %vm499_vm0, %v510_v3  ;;  %2140 = vmatprep.mubr.msk.f32.mxu0 %vm500_vm1, %v526_v4  ;;  %v2104_v13 = vpop.f32.mrb[4].mxu0  ;;  %v584_v2 = vld [vmem:[#allocation8 + $0x158] sm:$0xff] }
 0x184   : > { %2383 = vmatpush3.bf16.msra.mxu1 %v2382_v62  ;;  %746 = vmatprep.mubr.f32.mxu1 %v3144_v57  ;;  %v458_v15 = vpop.f32.mrb[5].mxu0  ;;  %v464_v19 = vadd.f32 %v2104_v13, %v3138_v47  ;;  %v3188_v28 = vrot.slane %v3158_v10, 1  ;;  %v3214_v50 = vrot.slane %v3158_v10, 7  ;;  %v570_v13 = vld [vmem:[#allocation8 + $0xe8] sm:$0xff] }
 0x185   : > { %2141 = vmatmul.mubr.msk.f32.vlgmr.msra.gmra.mrb[8].mxu0 %vm500_vm1, %v3156_v9  ;;  %2385 = vmatprep.subr.bf16.mxu1 %v2384_v5  ;;  %v3179_v20 = vrot.slane %v3160_v11, 1  ;;  %v459_v21 = vadd.f32 %v3138_v47, %v458_v15  ;;  %v3191_v29 = vrot.slane %v3160_v11, 7  ;;  %v2400_v5 = vpack.c.bf16 %v568_v60, %v567_v59  ;;  %v1157_v59 = vld [vmem:[#allocation8 + $0x398] sm:$0xff] }
 0x186   : > { %2415 = vmatpush3.bf16.msra.mxu0 %v2412_v45  ;;  %v3194_v36 = vmax.f32 %v464_v19, 0.0  ;;  %v2424_v45 = vpack.c.bf16 %v580_v34, %v579_v33  ;;  %v585_v19 = vld [vmem:[#allocation8 + $0x160] sm:$0xff]  ;;  %v2406_v33 = vpack.c.bf16 %v554_v25, %v553_v24  ;;  %v587_v34 = vld [vmem:[#allocation8 + $0x170] sm:$0xff]  ;;  %v1143_v25 = vld [vmem:[#allocation8 + $0x328] sm:$0xff] }
 0x187   : > { %1720 = vmatmul.mubr.msk.f32.gmra.mrb[2].mxu1 %vm499_vm0, %v3175_v18  ;;  %2417 = vmatprep.subr.bf16.mxu0 %v2416_v12  ;;  %v3185_v27 = vmax.f32 %v459_v21, 0.0  ;;  %v2107_v30 = vpop.f32.mrb[6].mxu0  ;;  %v586_v21 = vld [vmem:[#allocation8 + $0x168] sm:$0xff]  ;;  %v1142_v24 = vld [vmem:[#allocation8 + $0x320] sm:$0xff] }
 0x188   : > { %2387 = vmatpush3.bf16.msra.mxu1 %v2386_v14  ;;  %751 = vmatprep.mubr.f32.mxu1 %v3160_v11  ;;  %v468_v35 = vpop.f32.mrb[7].mxu0  ;;  %v474_v40 = vadd.f32 %v2107_v30, %v3138_v47  ;;  %v3219_v53 = vrot.slane %v3194_v36, 1  ;;  %v2858_v14 = vmov 0.0   ;;  %v3249_v22 = vrot.slane %v3194_v36, 7  ;;  %v572_v30 = vld [vmem:[#allocation8 + $0xf8] sm:$0xff] }
 0x189   : > { %2143 = vmatprep.mubr.msk.f32.mxu0 %vm500_vm1, %v3179_v20  ;;  %2389 = vmatprep.subr.bf16.mxu1 %v2388_v16  ;;  %v469_v41 = vadd.f32 %v3138_v47, %v468_v35  ;;  %v3202_v42 = vrot.slane %v3185_v27, 1  ;;  %v2394_v47 = vpack.c.bf16 %v548_v39, %v547_v38  ;;  %v3231_v62 = vrot.slane %v3185_v27, 7  ;;  %v588_v35 = vld [vmem:[#allocation8 + $0x178] sm:$0xff]  ;;  %v555_v38 = vld [vmem:[#allocation8 + $0x70] sm:$0xff] }
 0x18a   : > { %2419 = vmatpush3.bf16.msra.mxu0 %v2416_v12  ;;  %v3216_v52 = vmax.f32 %v474_v40, 0.0  ;;  %v569_v12 = vld [vmem:[#allocation8 + $0xe0] sm:$0xff]  ;;  %v3242_v15 = vrot.slane %v2858_v14, 1  ;;  %v2432_v16 = vpack.c.bf16 %v584_v2, %v583_v1  ;;  %v556_v39 = vld [vmem:[#allocation8 + $0x78] sm:$0xff]  ;;  %v2440_v43 = vpack.c.bf16 %v588_v35, %v587_v34  ;;  %v1172_v1 = vld [vmem:[#allocation8 + $0x410] sm:$0xff] }
 0x18b   : > { %2144 = vmatmul.mubr.msk.f32.gmra.mrb[10].mxu0 %vm500_vm1, %v3188_v28  ;;  %1721 = vmatmul.mubr.msk.f32.gmra.mrb[4].mxu1 %vm499_vm0, %v3191_v29  ;;  %v3210_v46 = vmax.f32 %v469_v41, 0.0  ;;  %v2404_v23 = vpack.c.bf16 %v570_v13, %v569_v12  ;;  %v1154_v40 = vld [vmem:[#allocation8 + $0x380] sm:$0xff]  ;;  %v1155_v41 = vld [vmem:[#allocation8 + $0x388] sm:$0xff]  ;;  %v2410_v44 = vpack.c.bf16 %v556_v39, %v555_v38  ;;  %v3275_v60 = vrot.slane %v2858_v14, 7  ;;  %v1173_v2 = vld [vmem:[#allocation8 + $0x418] sm:$0xff] }
 0x18c   : > { %2391 = vmatpush3.bf16.msra.mxu1 %v2390_v31  ;;  %2421 = vmatprep.subr.bf16.mxu0 %v2420_v32  ;;  %v620_v8 = vrot.slane %v3216_v52, 1  ;;  %v604_v48 = vrot.slane %v3216_v52, 7  ;;  %v2444_v49 = vpack.c.bf16 %v1155_v41, %v1154_v40  ;;  %v1158_v12 = vld [vmem:[#allocation8 + $0x3a0] sm:$0xff]  ;;  %v1159_v13 = vld [vmem:[#allocation8 + $0x3a8] sm:$0xff]  ;;  %v1177_v34 = vld [vmem:[#allocation8 + $0x438] sm:$0xff] }
 0x18d   : > { %756 = vmatprep.mubr.f32.mxu1 %v3158_v10  ;;  %2393 = vmatprep.subr.bf16.mxu1 %v2392_v37  ;;  %v3225_v61 = vrot.slane %v3210_v46, 1  ;;  %v3262_v31 = vrot.slane %v3210_v46, 7  ;;  %v2408_v37 = vpack.c.bf16 %v572_v30, %v571_v26  ;;  %v1160_v26 = vld [vmem:[#allocation8 + $0x3b0] sm:$0xff]  ;;  %v1161_v30 = vld [vmem:[#allocation8 + $0x3b8] sm:$0xff]  ;;  %v1178_v41 = vld [vmem:[#allocation8 + $0x440] sm:$0xff] }
 0x18e   : > { %2423 = vmatpush3.bf16.msra.mxu0 %v2420_v32  ;;  %2146 = vmatprep.mubr.msk.f32.mxu0 %vm500_vm1, %v3202_v42  ;;  %v2436_v32 = vpack.c.bf16 %v586_v21, %v585_v19  ;;  %v1174_v19 = vld [vmem:[#allocation8 + $0x420] sm:$0xff]  ;;  %v1175_v21 = vld [vmem:[#allocation8 + $0x428] sm:$0xff]  ;;  %v2456_v35 = vpack.c.bf16 %v1161_v30, %v1160_v26  ;;  %v1145_v38 = vld [vmem:[#allocation8 + $0x338] sm:$0xff] }
 0x18f   : > { %1722 = vmatmul.mubr.msk.f32.gmra.mrb[6].mxu1 %vm499_vm0, %v3214_v50  ;;  %2425 = vmatprep.subr.bf16.mxu0 %v2424_v45  ;;  %v1184_v26 = vld [vmem:[#allocation8 + $0x470] sm:$0xff]  ;;  %v1185_v30 = vld [vmem:[#allocation8 + $0x478] sm:$0xff] }
 0x190   : > { %2395 = vmatpush3.bf16.msra.mxu1 %v2394_v47  ;;  %761 = vmatprep.mubr.f32.mxu1 %v3185_v27  ;;  %v1171_v47 = vld [vmem:[#allocation8 + $0x408] sm:$0xff] }
 0x191   : > { %2147 = vmatmul.mubr.msk.f32.gmra.mrb[12].mxu0 %vm500_vm1, %v3219_v53  ;;  %2397 = vmatprep.subr.bf16.mxu1 %v2396_v54  ;;  %v1138_v54 = vld [vmem:[#allocation8 + $0x300] sm:$0xff] }
 0x192   : > { %2427 = vmatpush3.bf16.msra.mxu0 %v2424_v45  ;;  %2149 = vmatprep.mubr.msk.f32.mxu0 %vm500_vm1, %v3225_v61  ;;  %v1170_v45 = vld [vmem:[#allocation8 + $0x400] sm:$0xff] }
 0x193   : > { %1723 = vmatmul.mubr.msk.f32.gmra.mrb[8].mxu1 %vm499_vm0, %v3231_v62  ;;  %2429 = vmatprep.subr.bf16.mxu0 %v2428_v63 }
 0x194   : > { %2399 = vmatpush3.bf16.msra.mxu1 %v2398_v0  ;;  %766 = vmatprep.mubr.f32.mxu1 %v3194_v36  ;;  %v2446_v0 = vpack.c.bf16 %v1139_v55, %v1138_v54  ;;  %v1165_v54 = vld [vmem:[#allocation8 + $0x3d8] sm:$0xff] }
 0x195   : > { %2401 = vmatprep.subr.bf16.mxu1 %v2400_v5  ;;  %2150 = vmatmul.mubr.msk.f32.gmra.mrb[14].mxu0 %vm500_vm1, %v620_v8  ;;  %v2448_v5 = vpack.c.bf16 %v1157_v59, %v1156_v56  ;;  %v1180_v59 = vld [vmem:[#allocation8 + $0x450] sm:$0xff] }
 0x196   : > { %2431 = vmatpush3.bf16.msra.mxu0 %v2428_v63  ;;  %2184 = vmatprep.mubr.msk.f32.mxu0 %vm500_vm1, %v3242_v15  ;;  %v2476_v63 = vpack.c.bf16 %v1171_v47, %v1170_v45  ;;  %v1146_v45 = vld [vmem:[#allocation8 + $0x340] sm:$0xff]  ;;  %v1147_v47 = vld [vmem:[#allocation8 + $0x348] sm:$0xff] }
 0x197   : > { %1724 = vmatmul.mubr.msk.f32.gmra.mrb[10].mxu1 %vm499_vm0, %v3249_v22  ;;  %2433 = vmatprep.subr.bf16.mxu0 %v2432_v16  ;;  %v2462_v56 = vpack.c.bf16 %v1147_v47, %v1146_v45 }
 0x198   : > { %2403 = vmatpush3.bf16.msra.mxu1 %v2402_v17  ;;  %771 = vmatprep.mubr.f32.mxu1 %v3210_v46  ;;  %v2450_v17 = vpack.c.bf16 %v1141_v7, %v1140_v6  ;;  %v1167_v6 = vld [vmem:[#allocation8 + $0x3e8] sm:$0xff] }
 0x199   : > { %2405 = vmatprep.subr.bf16.mxu1 %v2404_v23  ;;  %v2452_v23 = vpack.c.bf16 %v1159_v13, %v1158_v12  ;;  %v1182_v13 = vld [vmem:[#allocation8 + $0x460] sm:$0xff] }
 0x19a   : > { %2435 = vmatpush3.bf16.msra.mxu0 %v2432_v16  ;;  %v2480_v16 = vpack.c.bf16 %v1173_v2, %v1172_v1  ;;  %v1148_v1 = vld [vmem:[#allocation8 + $0x350] sm:$0xff]  ;;  %v1149_v2 = vld [vmem:[#allocation8 + $0x358] sm:$0xff] }
 0x19b   : > { %1725 = vmatmul.mubr.msk.f32.gmra.mrb[12].mxu1 %vm499_vm0, %v3262_v31  ;;  %2437 = vmatprep.subr.bf16.mxu0 %v2436_v32  ;;  %v2466_v12 = vpack.c.bf16 %v1149_v2, %v1148_v1 }
 0x19c   : > { %2407 = vmatpush3.bf16.msra.mxu1 %v2406_v33  ;;  %776 = vmatprep.mubr.f32.mxu1 %v3216_v52  ;;  %v1176_v33 = vld [vmem:[#allocation8 + $0x430] sm:$0xff] }
 0x19d   : > { %2409 = vmatprep.subr.bf16.mxu1 %v2408_v37  ;;  %v1144_v37 = vld [vmem:[#allocation8 + $0x330] sm:$0xff]  ;;  %v2488_v39 = vpack.c.bf16 %v1177_v34, %v1176_v33  ;;  %v1153_v33 = vld [vmem:[#allocation8 + $0x378] sm:$0xff]  ;;  %v2504_v34 = vpack.c.bf16 %v1185_v30, %v1184_v26 }
 0x19e   : > { %2439 = vmatpush3.bf16.msra.mxu0 %v2436_v32  ;;  %v2484_v32 = vpack.c.bf16 %v1175_v21, %v1174_v19  ;;  %v2458_v40 = vpack.c.bf16 %v1145_v38, %v1144_v37  ;;  %v1150_v19 = vld [vmem:[#allocation8 + $0x360] sm:$0xff]  ;;  %v1151_v21 = vld [vmem:[#allocation8 + $0x368] sm:$0xff] }
 0x19f   : > { %1726 = vmatmul.mubr.msk.f32.gmra.mrb[14].mxu1 %vm499_vm0, %v604_v48  ;;  %2441 = vmatprep.subr.bf16.mxu0 %v2440_v43 }
 0x1a0   : > { %2411 = vmatpush3.bf16.msra.mxu1 %v2410_v44  ;;  %951 = vmatprep.mubr.f32.mxu1 %v2858_v14 }
 0x1a1   : > { %2445 = vmatprep.subr.bf16.mxu1 %v2444_v49  ;;  %v1164_v49 = vld [vmem:[#allocation8 + $0x3d0] sm:$0xff] }
 0x1a2   : > { %2443 = vmatpush3.bf16.msra.mxu0 %v2440_v43  ;;  %v1179_v43 = vld [vmem:[#allocation8 + $0x448] sm:$0xff] }
 0x1a3   : > { %1735 = vmatmul.mubr.msk.f32.vlgmr.msra.gmra.mrb[16].mxu1 %vm499_vm0, %v3275_v60  ;;  %2477 = vmatprep.subr.bf16.mxu0 %v2476_v63  ;;  %v2492_v55 = vpack.c.bf16 %v1179_v43, %v1178_v41 }
 0x1a4   : > { %2447 = vmatpush3.bf16.msra.mxu1 %v2446_v0  ;;  %956 = vmatprep.mubr.f32.mxu1 %v3146_v58  ;;  %v1162_v58 = vld [vmem:[#allocation8 + $0x3c0] sm:$0xff]  ;;  %v2464_v0 = vpack.c.bf16 %v1165_v54, %v1164_v49 }
 0x1a5   : > { %2185 = vmatmul.mubr.msk.f32.vlgmr.msra.gmra.mrb[8].mxu0 %vm500_vm1, %v526_v4  ;;  %2449 = vmatprep.subr.bf16.mxu1 %v2448_v5  ;;  %v2454_v4 = vpack.c.bf16 %v1143_v25, %v1142_v24  ;;  %v1166_v5 = vld [vmem:[#allocation8 + $0x3e0] sm:$0xff]  ;;  %v2470_v25 = vpack.c.bf16 %v1151_v21, %v1150_v19 }
 0x1a6   : > { %2187 = vmatprep.mubr.msk.f32.mxu0 %vm500_vm1, %v3156_v9  ;;  %2479 = vmatpush3.bf16.msra.mxu0 %v2476_v63  ;;  %v1181_v63 = vld [vmem:[#allocation8 + $0x458] sm:$0xff] }
 0x1a7   : > { %1736 = vmatmul.mubr.msk.f32.gmra.mrb[18].mxu1 %vm499_vm0, %v510_v3  ;;  %2481 = vmatprep.subr.bf16.mxu0 %v2480_v16  ;;  %v1163_v3 = vld [vmem:[#allocation8 + $0x3c8] sm:$0xff]  ;;  %v2496_v7 = vpack.c.bf16 %v1181_v63, %v1180_v59 }
 0x1a8   : > { %2451 = vmatpush3.bf16.msra.mxu1 %v2450_v17  ;;  %961 = vmatprep.mubr.f32.mxu1 %v3144_v57  ;;  %v2460_v44 = vpack.c.bf16 %v1163_v3, %v1162_v58  ;;  %v2468_v17 = vpack.c.bf16 %v1167_v6, %v1166_v5 }
 0x1a9   : > { %2188 = vmatmul.mubr.msk.f32.gmra.mrb[10].mxu0 %vm500_vm1, %v3179_v20  ;;  %2453 = vmatprep.subr.bf16.mxu1 %v2452_v23  ;;  %v1169_v23 = vld [vmem:[#allocation8 + $0x3f8] sm:$0xff] }
 0x1aa   : > { %2190 = vmatprep.mubr.msk.f32.mxu0 %vm500_vm1, %v3188_v28  ;;  %2483 = vmatpush3.bf16.msra.mxu0 %v2480_v16  ;;  %v1183_v16 = vld [vmem:[#allocation8 + $0x468] sm:$0xff] }
 0x1ab   : > { %1737 = vmatmul.mubr.msk.f32.gmra.mrb[20].mxu1 %vm499_vm0, %v3175_v18  ;;  %2485 = vmatprep.subr.bf16.mxu0 %v2484_v32  ;;  %v2500_v24 = vpack.c.bf16 %v1183_v16, %v1182_v13 }
 0x1ac   : > { %2455 = vmatpush3.bf16.msra.mxu1 %v2454_v4  ;;  %966 = vmatprep.mubr.f32.mxu1 %v3160_v11  ;;  %v1152_v4 = vld [vmem:[#allocation8 + $0x370] sm:$0xff] }
 0x1ad   : > { %2191 = vmatmul.mubr.msk.f32.gmra.mrb[12].mxu0 %vm500_vm1, %v3202_v42  ;;  %2457 = vmatprep.subr.bf16.mxu1 %v2456_v35  ;;  %v2474_v35 = vpack.c.bf16 %v1153_v33, %v1152_v4 }
 0x1ae   : > { %2193 = vmatprep.mubr.msk.f32.mxu0 %vm500_vm1, %v3219_v53  ;;  %2487 = vmatpush3.bf16.msra.mxu0 %v2484_v32 }
 0x1af   : > { %1738 = vmatmul.mubr.msk.f32.gmra.mrb[22].mxu1 %vm499_vm0, %v3191_v29  ;;  %2489 = vmatprep.subr.bf16.mxu0 %v2488_v39 }
 0x1b0   : > { %2459 = vmatpush3.bf16.msra.mxu1 %v2458_v40  ;;  %971 = vmatprep.mubr.f32.mxu1 %v3158_v10 }
 0x1b1   : > { %2194 = vmatmul.mubr.msk.f32.gmra.mrb[14].mxu0 %vm500_vm1, %v3225_v61  ;;  %2461 = vmatprep.subr.bf16.mxu1 %v2460_v44 }
 0x1b2   : > { %2491 = vmatpush3.bf16.msra.mxu0 %v2488_v39  ;;  %2228 = vmatprep.mubr.msk.f32.mxu0 %vm500_vm1, %v3156_v9  ;;  %v1168_v9 = vld [vmem:[#allocation8 + $0x3f0] sm:$0xff] }
 0x1b3   : > { %1739 = vmatmul.mubr.msk.f32.gmra.mrb[24].mxu1 %vm499_vm0, %v3214_v50  ;;  %2493 = vmatprep.subr.bf16.mxu0 %v2492_v55  ;;  %v2472_v32 = vpack.c.bf16 %v1169_v23, %v1168_v9 }
 0x1b4   : > { %2463 = vmatpush3.bf16.msra.mxu1 %v2462_v56  ;;  %976 = vmatprep.mubr.f32.mxu1 %v3185_v27 }
 0x1b5   : > { %2465 = vmatprep.subr.bf16.mxu1 %v2464_v0 }
 0x1b6   : > { %2495 = vmatpush3.bf16.msra.mxu0 %v2492_v55 }
 0x1b7   : > { %1740 = vmatmul.mubr.msk.f32.gmra.mrb[26].mxu1 %vm499_vm0, %v3231_v62  ;;  %2497 = vmatprep.subr.bf16.mxu0 %v2496_v7 }
 0x1b8   : > { %2467 = vmatpush3.bf16.msra.mxu1 %v2466_v12  ;;  %981 = vmatprep.mubr.f32.mxu1 %v3194_v36 }
 0x1b9   : > { %2469 = vmatprep.subr.bf16.mxu1 %v2468_v17 }
 0x1ba   : > { %2499 = vmatpush3.bf16.msra.mxu0 %v2496_v7 }
 0x1bb   : > { %1741 = vmatmul.mubr.msk.f32.gmra.mrb[28].mxu1 %vm499_vm0, %v3249_v22  ;;  %2501 = vmatprep.subr.bf16.mxu0 %v2500_v24 }
 0x1bc   : > { %2471 = vmatpush3.bf16.msra.mxu1 %v2470_v25  ;;  %986 = vmatprep.mubr.f32.mxu1 %v3210_v46 }
 0x1bd   : > { %2473 = vmatprep.subr.bf16.mxu1 %v2472_v32 }
 0x1be   : > { %2503 = vmatpush3.bf16.msra.mxu0 %v2500_v24 }
 0x1bf   : > { %1742 = vmatmul.mubr.msk.f32.gmra.mrb[30].mxu1 %vm499_vm0, %v3262_v31  ;;  %2505 = vmatprep.subr.bf16.mxu0 %v2504_v34 }
 0x1c0   : > { %2475 = vmatpush3.bf16.msra.mxu1 %v2474_v35  ;;  %1250 = vmatprep.mubr.f32.mxu1 %v3144_v57  ;;  %v1427_v57 = vld [vmem:[#allocation9] sm:$0xff] }
 0x1c2   : > { %2507 = vmatpush3.bf16.msra.mxu0 %v2504_v34 }
 0x1c3   : > { %1751 = vmatmul.mubr.msk.f32.vlgmr.msra.gmra.mrb[32].mxu1 %vm499_vm0, %v3175_v18  ;;  %v1429_v18 = vld [vmem:[#allocation9 + $0x10] sm:$0xff] }
 0x1c4   : > { %1255 = vmatprep.mubr.f32.mxu1 %v3160_v11 }
 0x1c5   : > { %2229 = vmatmul.mubr.msk.f32.vlgmr.msra.gmra.mrb[8].mxu0 %vm500_vm1, %v3179_v20  ;;  %v1430_v20 = vld [vmem:[#allocation9 + $0x18] sm:$0xff] }
 0x1c6   : > { %2231 = vmatprep.mubr.msk.f32.mxu0 %vm500_vm1, %v3188_v28  ;;  %v1431_v28 = vld [vmem:[#allocation9 + $0x20] sm:$0xff] }
 0x1c7   : > { %1752 = vmatmul.mubr.msk.f32.gmra.mrb[34].mxu1 %vm499_vm0, %v3191_v29  ;;  %v1432_v29 = vld [vmem:[#allocation9 + $0x28] sm:$0xff] }
 0x1c8   : > { %1260 = vmatprep.mubr.f32.mxu1 %v3158_v10  ;;  %v1428_v10 = vld [vmem:[#allocation9 + $0x8] sm:$0xff] }
 0x1c9   : > { %2232 = vmatmul.mubr.msk.f32.gmra.mrb[10].mxu0 %vm500_vm1, %v3202_v42  ;;  %v2508_v11 = vpack.c.bf16 %v1428_v10, %v1427_v57  ;;  %v1433_v42 = vld [vmem:[#allocation9 + $0x30] sm:$0xff] }
 0x1ca   : > { %2234 = vmatprep.mubr.msk.f32.mxu0 %vm500_vm1, %v3219_v53 }
 0x1cb   : > { %1753 = vmatmul.mubr.msk.f32.gmra.mrb[36].mxu1 %vm499_vm0, %v3214_v50  ;;  %2509 = vmatprep.subr.bf16.mxu1 %v2508_v11 }
 0x1cc   : > { %1265 = vmatprep.mubr.f32.mxu1 %v3185_v27  ;;  %2511 = vmatpush3.bf16.msra.mxu1 %v2508_v11  ;;  %v2512_v27 = vpack.c.bf16 %v1430_v20, %v1429_v18 }
 0x1cd   : > { %2235 = vmatmul.mubr.msk.f32.gmra.mrb[12].mxu0 %vm500_vm1, %v3225_v61  ;;  %v1437_v61 = vld [vmem:[#allocation9 + $0x50] sm:$0xff] }
 0x1ce   : > { %2237 = vmatprep.mubr.msk.f32.mxu0 %vm500_vm1, %v620_v8  ;;  %2513 = vmatprep.subr.bf16.mxu1 %v2512_v27 }
 0x1cf   : > { %1754 = vmatmul.mubr.msk.f32.gmra.mrb[38].mxu1 %vm499_vm0, %v3231_v62  ;;  %v1438_v62 = vld [vmem:[#allocation9 + $0x58] sm:$0xff] }
 0x1d0   : > { %1270 = vmatprep.mubr.f32.mxu1 %v3194_v36  ;;  %2515 = vmatpush3.bf16.msra.mxu1 %v2512_v27  ;;  %v2516_v36 = vpack.c.bf16 %v1432_v29, %v1431_v28  ;;  %v2528_v8 = vpack.c.bf16 %v1438_v62, %v1437_v61 }
 0x1d1   : > { %2238 = vmatmul.mubr.msk.f32.gmra.mrb[14].mxu0 %vm500_vm1, %v3242_v15  ;;  %v1440_v15 = vld [vmem:[#allocation9 + $0x68] sm:$0xff] }
 0x1d2   : > { %2517 = vmatprep.subr.bf16.mxu1 %v2516_v36 }
 0x1d3   : > { %1755 = vmatmul.mubr.msk.f32.gmra.mrb[40].mxu1 %vm499_vm0, %v3249_v22 }
 0x1d4   : > { %1275 = vmatprep.mubr.f32.mxu1 %v3210_v46  ;;  %2519 = vmatpush3.bf16.msra.mxu1 %v2516_v36  ;;  %v1434_v46 = vld [vmem:[#allocation9 + $0x38] sm:$0xff] }
 0x1d5   : > { %v2520_v50 = vpack.c.bf16 %v1434_v46, %v1433_v42 }
 0x1d7   : > { %1756 = vmatmul.mubr.msk.f32.gmra.mrb[42].mxu1 %vm499_vm0, %v3262_v31  ;;  %2521 = vmatprep.subr.bf16.mxu1 %v2520_v50  ;;  %v1441_v31 = vld [vmem:[#allocation9 + $0x70] sm:$0xff] }
 0x1d8   : > { %1280 = vmatprep.mubr.f32.mxu1 %v3216_v52  ;;  %2523 = vmatpush3.bf16.msra.mxu1 %v2520_v50  ;;  %v1436_v52 = vld [vmem:[#allocation9 + $0x48] sm:$0xff] }
 0x1d9   : > { %v2524_v53 = vpack.c.bf16 %v1436_v52, %v1435_v51 }
 0x1db   : > { %1757 = vmatmul.mubr.msk.f32.gmra.mrb[44].mxu1 %vm499_vm0, %v604_v48  ;;  %2525 = vmatprep.subr.bf16.mxu1 %v2524_v53  ;;  %v1442_v48 = vld [vmem:[#allocation9 + $0x78] sm:$0xff] }
 0x1dc   : > { %1285 = vmatprep.mubr.f32.mxu1 %v2858_v14  ;;  %2527 = vmatpush3.bf16.msra.mxu1 %v2524_v53  ;;  %v1439_v14 = vld [vmem:[#allocation9 + $0x60] sm:$0xff] }
 0x1dd   : > { %2529 = vmatprep.subr.bf16.mxu1 %v2528_v8  ;;  %v2532_v22 = vpack.c.bf16 %v1440_v15, %v1439_v14 }
 0x1df   : > { %1758 = vmatmul.mubr.msk.f32.gmra.mrb[46].mxu1 %vm499_vm0, %v3275_v60  ;;  %v2536_v60 = vpack.c.bf16 %v1442_v48, %v1441_v31 }
 0x1e0   : > { %2531 = vmatpush3.bf16.msra.mxu1 %v2528_v8 }
 0x1e1   : > { %2533 = vmatprep.subr.bf16.mxu1 %v2532_v22 }
 0x1e4   : > { %2535 = vmatpush3.bf16.msra.mxu1 %v2532_v22 }
 0x1e5   : > { %2537 = vmatprep.subr.bf16.mxu1 %v2536_v60 }
 0x1e8   : > { %2539 = vmatpush3.bf16.msra.mxu1 %v2536_v60  ;;  %v3395_v60 = vld [vmem:[%s3484_s4] ss:$0 sm:$0xff] }
 0x256   : > { %v1832_v37 = vpop.f32.mrb[0].mxu1 }
 0x257   : > { %v1833_v38 = vpop.f32.mrb[1].mxu1 }
 0x258   : > { %v1834_v58 = vadd.f32 %v1833_v38, %v1832_v37 }
 0x25a   : > { %v1835_v3 = vpop.f32.mrb[2].mxu1 }
 0x25b   : > { %v1836_v39 = vpop.f32.mrb[3].mxu1 }
 0x25c   : > { %v1837_v40 = vadd.f32 %v1836_v39, %v1835_v3 }
 0x25e   : > { %v1838_v41 = vpop.f32.mrb[4].mxu1 }
 0x25f   : > { %v1839_v43 = vpop.f32.mrb[5].mxu1 }
 0x260   : > { %v1840_v44 = vadd.f32 %v1839_v43, %v1838_v41 }
 0x262   : > { %v1841_v45 = vpop.f32.mrb[6].mxu1 }
 0x263   : > { %v1842_v47 = vpop.f32.mrb[7].mxu1 }
 0x264   : > { %v1843_v49 = vadd.f32 %v1842_v47, %v1841_v45 }
 0x266   : > { %v1844_v54 = vpop.f32.mrb[8].mxu1 }
 0x267   : > { %v1845_v55 = vpop.f32.mrb[9].mxu1 }
 0x268   : > { %v1846_v56 = vadd.f32 %v1845_v55, %v1844_v54 }
 0x26a   : > { %v1847_v59 = vpop.f32.mrb[10].mxu1 }
 0x26b   : > { %v1848_v63 = vpop.f32.mrb[11].mxu1 }
 0x26c   : > { %v1849_v0 = vadd.f32 %v1848_v63, %v1847_v59 }
 0x26e   : > { %v1850_v1 = vpop.f32.mrb[12].mxu1 }
 0x26f   : > { %v1851_v2 = vpop.f32.mrb[13].mxu1 }
 0x270   : > { %v1852_v5 = vadd.f32 %v1851_v2, %v1850_v1 }
 0x272   : > { %v1853_v6 = vpop.f32.mrb[14].mxu1 }
 0x273   : > { %v1854_v7 = vpop.f32.mrb[15].mxu1 }
 0x274   : > { %v1855_v12 = vadd.f32 %v1854_v7, %v1853_v6 }
 0x276   : > { %v1912_v13 = vpop.f32.mrb[16].mxu1 }
 0x277   : > { %v1913_v16 = vpop.f32.mrb[17].mxu1 }
 0x278   : > { %v1914_v17 = vadd.f32 %v1913_v16, %v1912_v13 }
 0x27a   : > { %v2543_v19 = vadd.f32 %v1914_v17, %v1834_v58  ;;  %v1915_v21 = vpop.f32.mrb[18].mxu1 }
 0x27b   : > { %v1916_v9 = vpop.f32.mrb[19].mxu1 }
 0x27c   : > { %v1917_v23 = vadd.f32 %v1916_v9, %v1915_v21 }
 0x27e   : > { %v2540_v24 = vadd.f32 %v1917_v23, %v1837_v40  ;;  %v1918_v25 = vpop.f32.mrb[20].mxu1 }
 0x27f   : > { %v1919_v26 = vpop.f32.mrb[21].mxu1 }
 0x280   : > { %v1920_v30 = vadd.f32 %v1919_v26, %v1918_v25 }
 0x282   : > { %v2549_v32 = vadd.f32 %v1920_v30, %v1840_v44  ;;  %v1921_v4 = vpop.f32.mrb[22].mxu1 }
 0x283   : > { %v1922_v33 = vpop.f32.mrb[23].mxu1 }
 0x284   : > { %v1923_v34 = vadd.f32 %v1922_v33, %v1921_v4 }
 0x286   : > { %v2546_v35 = vadd.f32 %v1923_v34, %v1843_v49  ;;  %v1924_v57 = vpop.f32.mrb[24].mxu1 }
 0x287   : > { %v1925_v10 = vpop.f32.mrb[25].mxu1 }
 0x288   : > { %v1926_v11 = vadd.f32 %v1925_v10, %v1924_v57 }
 0x28a   : > { %v2555_v18 = vadd.f32 %v1926_v11, %v1846_v56  ;;  %v1927_v20 = vpop.f32.mrb[26].mxu1 }
 0x28b   : > { %v1928_v27 = vpop.f32.mrb[27].mxu1 }
 0x28c   : > { %v1929_v28 = vadd.f32 %v1928_v27, %v1927_v20 }
 0x28e   : > { %v2552_v29 = vadd.f32 %v1929_v28, %v1849_v0  ;;  %v1930_v36 = vpop.f32.mrb[28].mxu1 }
 0x28f   : > { %v1931_v42 = vpop.f32.mrb[29].mxu1 }
 0x290   : > { %v1932_v46 = vadd.f32 %v1931_v42, %v1930_v36 }
 0x292   : > { %v2561_v50 = vadd.f32 %v1932_v46, %v1852_v5  ;;  %v1933_v51 = vpop.f32.mrb[30].mxu1 }
 0x293   : > { %v1934_v52 = vpop.f32.mrb[31].mxu1 }
 0x294   : > { %v1935_v53 = vadd.f32 %v1934_v52, %v1933_v51 }
 0x296   : > { %v3390_v61 = vadd.f32 %v1935_v53, %v1855_v12  ;;  %v1992_v62 = vpop.f32.mrb[32].mxu1 }
 0x297   : > { %v1993_v8 = vpop.f32.mrb[33].mxu1 }
 0x298   : > { %v2230_v14 = vpop.f32.mrb[8].mxu0  ;;  %v1994_v15 = vadd.f32 %v1993_v8, %v1992_v62 }
 0x299   : > { %v1357_v22 = vpop.f32.mrb[9].mxu0 }
 0x29a   : > { %v2544_v31 = vadd.f32 %v2543_v19, %v1994_v15  ;;  %v1995_v48 = vpop.f32.mrb[34].mxu1 }
 0x29b   : > { %v1996_v37 = vpop.f32.mrb[35].mxu1 }
 0x29c   : > { %v2545_v38 = vadd.f32 %v2544_v31, %v1357_v22  ;;  %v2233_v58 = vpop.f32.mrb[10].mxu0  ;;  %v1997_v3 = vadd.f32 %v1996_v37, %v1995_v48  ;;  %v1556_v22 = vld [vmem:[%s3113_s8 + $0x8] sm:$0xff]  ;;  %v1555_v48 = vld [vmem:[%s3113_s8] sm:$0xff] }
 0x29d   : > { %v1367_v39 = vpop.f32.mrb[11].mxu0 }
 0x29e   : > { %v1411_v40 = vadd.f32 %v2545_v38, %v3395_v60  ;;  %v2541_v41 = vadd.f32 %v2540_v24, %v1997_v3  ;;  %v1998_v43 = vpop.f32.mrb[36].mxu1 }
 0x29f   : > { %v1999_v44 = vpop.f32.mrb[37].mxu1 }
 0x2a0   : > { %v1419_v45 = vmax.f32 %v1411_v40, 0.0  ;;  %v2542_v47 = vadd.f32 %v2541_v41, %v2230_v14  ;;  %v2236_v49 = vpop.f32.mrb[12].mxu0  ;;  %v2000_v54 = vadd.f32 %v1999_v44, %v1998_v43  ;;  %v1768_v14 = vld [vmem:[%s3486_s6] ss:$0 sm:$0xff]  ;;  %v1558_v40 = vld [vmem:[%s3113_s8 + $0x18] sm:$0xff]  ;;  %v1557_v44 = vld [vmem:[%s3113_s8 + $0x10] sm:$0xff] }
 0x2a1   : > { %v1377_v55 = vpop.f32.mrb[13].mxu0 }
 0x2a2   : > { %v1412_v56 = vadd.f32 %v2542_v47, %v3395_v60  ;;  %v2550_v59 = vadd.f32 %v2549_v32, %v2000_v54  ;;  %v2001_v63 = vpop.f32.mrb[38].mxu1  ;;  %2272 = vmatprep.mubr.f32.mxu1 %v1419_v45 }
 0x2a3   : > { %v2002_v0 = vpop.f32.mrb[39].mxu1 }
 0x2a4   : > { %v1420_v1 = vmax.f32 %v1412_v56, 0.0  ;;  %v2551_v2 = vadd.f32 %v2550_v59, %v1367_v39  ;;  %v2239_v5 = vpop.f32.mrb[14].mxu0  ;;  %v2003_v6 = vadd.f32 %v2002_v0, %v2001_v63  ;;  %v1560_v59 = vld [vmem:[%s3113_s8 + $0x28] sm:$0xff] }
 0x2a5   : > { %v1387_v7 = vpop.f32.mrb[15].mxu0 }
 0x2a6   : > { %v2547_v12 = vadd.f32 %v2546_v35, %v2003_v6  ;;  %v2004_v13 = vpop.f32.mrb[40].mxu1  ;;  %2273 = vmatmul.mubr.f32.vlgmr.msra.gmra.mrb[48].mxu1 %v1420_v1  ;;  %v1413_v16 = vadd.f32 %v2551_v2, %v3395_v60  ;;  %v1559_v1 = vld [vmem:[%s3113_s8 + $0x20] sm:$0xff] }
 0x2a7   : > { %v2005_v17 = vpop.f32.mrb[41].mxu1 }
 0x2a8   : > { %v2548_v19 = vadd.f32 %v2547_v12, %v2233_v58  ;;  %v2006_v21 = vadd.f32 %v2005_v17, %v2004_v13  ;;  %v1421_v9 = vmax.f32 %v1413_v16, 0.0  ;;  %v1562_v16 = vld [vmem:[%s3113_s8 + $0x38] sm:$0xff] }
 0x2aa   : > { %v2556_v23 = vadd.f32 %v2555_v18, %v2006_v21  ;;  %v2007_v24 = vpop.f32.mrb[42].mxu1  ;;  %2275 = vmatprep.mubr.f32.mxu1 %v1421_v9  ;;  %v1414_v25 = vadd.f32 %v2548_v19, %v3395_v60  ;;  %v1561_v21 = vld [vmem:[%s3113_s8 + $0x30] sm:$0xff]  ;;  %s2776_s8 = scalar_lea.vmem %s3429_s20, 1024 }
 0x2ab   : > { %v2008_v26 = vpop.f32.mrb[43].mxu1  ;;  %p2777_p10 = scmp.ne.s32.totalorder %s3429_s20, %s2776_s8  ;;  %p2784_p1 = scmp.lt.s32.totalorder %s2782_s9, %s2776_s8 }
 0x2ac   : > { %v2557_v30 = vadd.f32 %v2556_v23, %v1377_v55  ;;  %v2009_v32 = vadd.f32 %v2008_v26, %v2007_v24  ;;  %v1422_v4 = vmax.f32 %v1414_v25, 0.0 }
 0x2ad   : > { %p2778_p3 = pnand %p2777_p10, %p3056_p5  ;;  %p2785_p2 = por %p2784_p1, %p2783_p12 }
 0x2ae   : > { %v2553_v33 = vadd.f32 %v2552_v29, %v2009_v32  ;;  %v2010_v34 = vpop.f32.mrb[44].mxu1  ;;  %2276 = vmatmul.mubr.f32.gmra.mrb[50].mxu1 %v1422_v4  ;;  %v1415_v35 = vadd.f32 %v2557_v30, %v3395_v60 }
 0x2af   : > { %v2011_v57 = vpop.f32.mrb[45].mxu1  ;;  %p2779_p7 = pneg %p2778_p3 }
 0x2b0   : > { %v2554_v10 = vadd.f32 %v2553_v33, %v2236_v49  ;;  %v2012_v11 = vadd.f32 %v2011_v57, %v2010_v34  ;;  %v1423_v20 = vmax.f32 %v1415_v35, 0.0 }
 0x2b1   : > { %p2786_p4 = pnand %p2785_p2, %p2779_p7 }
 0x2b2   : > { %v2562_v27 = vadd.f32 %v2561_v50, %v2012_v11  ;;  %v2013_v28 = vpop.f32.mrb[46].mxu1  ;;  %2278 = vmatprep.mubr.f32.mxu1 %v1423_v20  ;;  %v1416_v18 = vadd.f32 %v2554_v10, %v3395_v60 }
 0x2b3   : > { %v2014_v36 = vpop.f32.mrb[47].mxu1 }
 0x2b4   : > { %v2563_v42 = vadd.f32 %v2562_v27, %v1387_v7  ;;  %v2015_v46 = vadd.f32 %v2014_v36, %v2013_v28  ;;  %v1424_v51 = vmax.f32 %v1416_v18, 0.0 }
 0x2b6   : > { %v2559_v29 = vadd.f32 %v3390_v61, %v2015_v46  ;;  %2279 = vmatmul.mubr.f32.gmra.mrb[52].mxu1 %v1424_v51  ;;  %v1417_v52 = vadd.f32 %v2563_v42, %v3395_v60 }
 0x2b8   : > { %v2560_v53 = vadd.f32 %v2559_v29, %v2239_v5  ;;  %v1425_v62 = vmax.f32 %v1417_v52, 0.0 }
 0x2ba   : > { %2281 = vmatprep.mubr.f32.mxu1 %v1425_v62  ;;  %v1418_v50 = vadd.f32 %v2560_v53, %v3395_v60 }
 0x2bc   : > { %v1426_v8 = vmax.f32 %v1418_v50, 0.0 }
 0x2be   : > { %2282 = vmatmul.mubr.f32.gmra.mrb[54].mxu1 %v1426_v8 }
 0x379   : > { %v2274_v15 = vpop.f32.mrb[48].mxu1 }
 0x37a   : > { %v1522_v61 = vadd.f32 %v2274_v15, %v1768_v14  ;;  %v1516_v31 = vpop.f32.mrb[49].mxu1 }
 0x37b   : > { %v1517_v37 = vadd.f32 %v1768_v14, %v1516_v31 }
 0x37c   : > { %v1564_v38 = vadd.f32 %v1556_v22, %v1522_v61 }
 0x37d   : > { %v1563_v58 = vadd.f32 %v1555_v48, %v1517_v37 }
 0x37e   : > { %v1572_v3 = vmax.f32 %v1564_v38, 0.0 }
 0x37f   : > { %v1571_v39 = vmax.f32 %v1563_v58, 0.0 }
 0x380   : > { %1580 = vst [vmem:[%s3413_s12 + $0x8] sm:$0xff] %v1572_v3 }
 0x381   : > { %1579 = vst [vmem:[%s3413_s12] sm:$0xff] %v1571_v39  ;;  %v2277_v60 = vpop.f32.mrb[50].mxu1 }
 0x382   : > { %v1532_v41 = vadd.f32 %v2277_v60, %v1768_v14  ;;  %v1526_v43 = vpop.f32.mrb[51].mxu1 }
 0x383   : > { %v1527_v45 = vadd.f32 %v1768_v14, %v1526_v43 }
 0x384   : > { %v1566_v47 = vadd.f32 %v1558_v40, %v1532_v41 }
 0x385   : > { %v1565_v49 = vadd.f32 %v1557_v44, %v1527_v45 }
 0x386   : > { %v1574_v54 = vmax.f32 %v1566_v47, 0.0 }
 0x387   : > { %v1573_v55 = vmax.f32 %v1565_v49, 0.0 }
 0x388   : > { %1582 = vst [vmem:[%s3413_s12 + $0x18] sm:$0xff] %v1574_v54 }
 0x389   : > { %1581 = vst [vmem:[%s3413_s12 + $0x10] sm:$0xff] %v1573_v55  ;;  %v2280_v56 = vpop.f32.mrb[52].mxu1 }
 0x38a   : > { %v1542_v63 = vadd.f32 %v2280_v56, %v1768_v14  ;;  %v1536_v0 = vpop.f32.mrb[53].mxu1 }
 0x38b   : > { %v1537_v2 = vadd.f32 %v1768_v14, %v1536_v0 }
 0x38c   : > { %v1568_v5 = vadd.f32 %v1560_v59, %v1542_v63 }
 0x38d   : > { %v1567_v6 = vadd.f32 %v1559_v1, %v1537_v2 }
 0x38e   : > { %v1576_v7 = vmax.f32 %v1568_v5, 0.0 }
 0x38f   : > { %v1575_v12 = vmax.f32 %v1567_v6, 0.0 }
 0x390   : > { %1584 = vst [vmem:[%s3413_s12 + $0x28] sm:$0xff] %v1576_v7 }
 0x391   : > { %1583 = vst [vmem:[%s3413_s12 + $0x20] sm:$0xff] %v1575_v12  ;;  %v2283_v13 = vpop.f32.mrb[54].mxu1 }
 0x392   : > { %v1552_v17 = vadd.f32 %v2283_v13, %v1768_v14  ;;  %v1546_v19 = vpop.f32.mrb[55].mxu1 }
 0x393   : > { %v1547_v9 = vadd.f32 %v1768_v14, %v1546_v19 }
 0x394   : > { %v1570_v23 = vadd.f32 %v1562_v16, %v1552_v17 }
 0x395   : > { %v1569_v24 = vadd.f32 %v1561_v21, %v1547_v9 }
 0x396   : > { %v1578_v25 = vmax.f32 %v1570_v23, 0.0 }
 0x397   : > { %v1577_v26 = vmax.f32 %v1569_v24, 0.0 }
 0x398   : > { %1586 = vst [vmem:[%s3413_s12 + $0x38] sm:$0xff] %v1578_v25 }
 0x399   : > { %1585 = vst [vmem:[%s3413_s12 + $0x30] sm:$0xff] %v1577_v26 }
 0x39a   : > { %2789 = shalt.err (!%p2786_p4)
}
 0x39b   : > { %s2790_s13 = scalar_lea.hbm %s3434_s23, 1024  ;;  %s2794_s14 = scalar_lea.hbm %s3487_s7, 2048 }
 0x39c   : > { %p2791_p9 = scmp.ne.s32.totalorder %s3434_s23, %s2790_s13  ;;  %p2795_p8 = scmp.lt.u32.totalorder %s3434_s23, %s3487_s7 }
 0x39d   : > { %p2796_p13 = scmp.lt.u32.totalorder %s2794_s14, %s2790_s13  ;;  %p2798_p10 = scmp.lt.u32.totalorder %s2790_s13, %s3434_s23 }
 0x39e   : > { %p2792_p0 = pnand %p2791_p9, %p3056_p5 }
 0x39f   : > { %p2797_p6 = por %p2796_p13, %p2795_p8 }
 0x3a0   : > { %p2793_p11 = pneg %p2792_p0 }
 0x3a1   : > { %p2799_p3 = por %p2798_p10, %p2797_p6 }
 0x3a3   : > { %p2800_p7 = pnand %p2799_p3, %p2793_p11 }
 0x3a5   : > { %2803 = shalt.err (!%p2800_p7)
}
 0x3a6   : > { %s2860_s16 = smov 128   ;;  %s2861_s29 = smov 8  }
 0x3a7   : > { %2594 = dma.vmem_to_hbm [thread:$0]  (%p3056_p5), %s3429_s20, 1024, %s3434_s23, %s1588_s11, %s2860_s16, %s2860_s16, %s2861_s29  }
 0x3a8 PF: > { %s3507_s8 = sld [smem:[#allocation16_spill]]  ;;  %s1616_s28 = sand.u32 1, %s2838_s24  }
 0x3a9   : > { %p3509_p1 = scmp.ge.s32.totalorder %s2850_s27, 2  ;;  %s1617_s30 = scalar_lea.sflag [#allocation5], %s1616_s28 }
 0x3ae   : > { %p3508_p12 = scmp.ne.s32.totalorder %s3507_s8, 0 }
 0x3b0   : > { %p2611_p2 = pnand %p3509_p1, %p3508_p12 }
 0x3b2   : > { %2833 = dma.done.wait (!%p2611_p2), %s1617_s30, 1024  }
 0x3b3   : > { %2835 = vsyncadd (!%p2611_p2), %s1617_s30, 4294966272  ;;  %p22_p4 = scmp.ge.s32.totalorder %s3042_s22, 4   ;;  %s3510_s24 = smov %s2842_s25 }
 0x3b4   : > { %s3511_s25 = smov %s2846_s26  ;;  %s3512_s26 = smov %s3052_s18 }
 0x3b5   : > { %s3513_s27 = smov %s3042_s22  ;;  %24 = sbr.rel (!%p22_p4) target bundleno = 7 (0x7), region = 108 }
 0x3bc   :  { %1622 = vsyncpa [#allocation4], 1 }
 0x3bd   :  { %1624 = vsyncpa [#allocation4 + $0x1], 1 }
 0x3be   :  { %1625 = vsyncpa [#allocation7], 1 }
 0x3bf   :  { %1626 = vsyncpa [#allocation10], 1 }
 0x3c0   :  { %1627 = vsyncpa [#allocation5], 1 }
 0x3c1   :  { %1629 = vsyncpa [#allocation5 + $0x1], 1 }

</bundles_post_ra>
